<compile_context>
chip_gen: v7x
topology: tpu7x:2x2x1
jax: 0.10.0
libtpu: 0.0.40
codegen_flags: <defaults>
</compile_context>

<pallas_src>
import functools

import jax
import jax.numpy as jnp
from jax.experimental import pallas as pl
from jax.experimental.pallas import tpu as pltpu


def _rbae_kernel(T,
                 x_ref, pre_ref,
                 we0_ref, be0_ref, we1_ref, be1_ref,
                 wh_ref, bh_ref,
                 wd0_ref, bd0_ref, wd1_ref, bd1_ref,
                 out_ref, hlast_ref,
                 h_scr):
    """One batch-block: rows = (batches in block) * T flattened (b, t) rows."""
    x = x_ref[...]                                        # (rows, D)
    rows = x.shape[0]
    bb = rows // T
    H = wh_ref.shape[0]

    # ---- encoder, batched over every (b, t) row: Linear->ReLU->Linear->Sigmoid
    e0 = jnp.dot(x, we0_ref[...], preferred_element_type=jnp.float32)
    e0 = jnp.maximum(e0 + be0_ref[...], 0.0)              # (rows, H0)
    h_all = jax.nn.sigmoid(
        jnp.dot(e0, we1_ref[...], preferred_element_type=jnp.float32)
        + be1_ref[...])                                   # (rows, H)

    # Stash h_all in VMEM scratch so the last-timestep rows can be pulled out
    # with a strided sublane read at the end (no full-sequence writeback).
    h_scr[...] = h_all

    # ---- build spikes_t = h_{t-1} (pre_spikes at t == 0) without a time loop:
    # roll rows down by one (XLU sublane rotate) and overwrite every T-th row
    # (the t == 0 rows) with that batch's pre_spikes.
    rolled = pltpu.roll(h_all, shift=1, axis=0)           # rolled[i] = h_all[i-1]
    # In-kernel expansion of pre_spikes (bb, H) -> (rows, H): sublane broadcast
    # + tile-aligned reshape; rides the otherwise-idle XLU / layout path.
    pre_rows = jnp.broadcast_to(
        pre_ref[...][:, None, :], (bb, T, H)).reshape(rows, H)
    row_id = jax.lax.broadcasted_iota(jnp.int32, (rows, H), 0)
    if (T & (T - 1)) == 0:                                # T power of two: cheap AND
        t0_mask = (row_id & (T - 1)) == 0
    else:                                                 # general T: integer mod
        t0_mask = (row_id % T) == 0
    spikes = jnp.where(t0_mask, pre_rows, rolled)

    # ---- recurrent hidden combine: sigmoid(spikes @ Wh + h + bh) -------------
    z = jax.nn.sigmoid(
        jnp.dot(spikes, wh_ref[...], preferred_element_type=jnp.float32)
        + h_all + bh_ref[...])                            # (rows, H)

    # ---- decoder: Linear -> ReLU -> Linear -> Sigmoid ------------------------
    d0 = jnp.dot(z, wd0_ref[...], preferred_element_type=jnp.float32)
    d0 = jnp.maximum(d0 + bd0_ref[...], 0.0)              # (rows, Hd)
    y = jax.nn.sigmoid(
        jnp.dot(d0, wd1_ref[...], preferred_element_type=jnp.float32)
        + bd1_ref[...])                                   # (rows, D)

    out_ref[...] = y
    # Only the t == T-1 rows of h are needed by the caller: strided sublane
    # read (stride T) straight from the scratch into the (bb, H) output.
    hlast_ref[...] = h_scr[pl.ds(T - 1, bb, stride=T), :]


def _full_spec(shape):
    nd = len(shape)
    return pl.BlockSpec(shape, lambda i, _n=nd: (0,) * _n)


@functools.partial(jax.jit, static_argnames=("batch_block",))
def rbae_forward(x, pre_spikes, params, *, batch_block=None):
    """x: (B, T, D) f32, pre_spikes: (B, H) f32 -> (outputs (B, T, D), h (B, H)).

    batch_block: batches per grid step.  Default B (grid=(1,)) — right choice
    on single-TC v5e/v6e.  On v7x with a large B, pass B // 2 so the
    "parallel" grid axis shards the batch halves across the two TensorCores.
    """
    B, T, D = x.shape
    H = pre_spikes.shape[1]
    weights = tuple(params)

    bb = B if batch_block is None else batch_block        # batches per grid step
    assert B % bb == 0, "batch_block must divide B"
    # Sublane divisibility when blocking the batch (block dims must be a
    # multiple of 8 unless they span the full array dim).
    assert bb == B or bb % 8 == 0, (
        "batch_block < B requires batch_block to be a multiple of 8")
    rows = bb * T                                          # rows per block

    # Contiguous (free) reshape; no transposes, no repeats in the wrapper.
    x2 = x.reshape(B * T, D)

    in_specs = [
        pl.BlockSpec((rows, D), lambda i: (i, 0)),         # x rows of this block
        pl.BlockSpec((bb, H), lambda i: (i, 0)),           # pre_spikes of this block
    ] + [_full_spec(w.shape) for w in weights]

    out_specs = [
        pl.BlockSpec((rows, D), lambda i: (i, 0)),         # y rows
        pl.BlockSpec((bb, H), lambda i: (i, 0)),           # h at last timestep
    ]

    y2, h_last = pl.pallas_call(
        functools.partial(_rbae_kernel, T),
        out_shape=(
            jax.ShapeDtypeStruct((B * T, D), jnp.float32),
            jax.ShapeDtypeStruct((B, H), jnp.float32),
        ),
        grid_spec=pltpu.PrefetchScalarGridSpec(
            num_scalar_prefetch=0,
            grid=(B // bb,),                               # (1,) at toy shapes
            in_specs=in_specs,
            out_specs=out_specs,
            scratch_shapes=[pltpu.VMEM((rows, H), jnp.float32)],
        ),
        # Batch blocks are fully independent -> shardable across v7x's 2 TCs.
        compiler_params=pltpu.CompilerParams(
            dimension_semantics=("parallel",)),
    )(x2, pre_spikes, *weights)

    outputs = y2.reshape(B, T, D)
    return outputs, h_last


def _ref_forward(x, pre_spikes, params):
    """Pure-JAX reference mirroring rbae.forward semantics (explicit T loop)."""
    we0, be0, we1, be1, wh, bh, wd0, bd0, wd1, bd1 = params
    spikes = pre_spikes
    outs = []
    h = spikes
    for t in range(x.shape[1]):
        xt = x[:, t]
        e0 = jnp.maximum(xt @ we0 + be0, 0.0)
        h = jax.nn.sigmoid(e0 @ we1 + be1)
        z = jax.nn.sigmoid(spikes @ wh + h + bh)
        d0 = jnp.maximum(z @ wd0 + bd0, 0.0)
        y = jax.nn.sigmoid(d0 @ wd1 + bd1)
        spikes = h
        outs.append(y[:, None])
    return jnp.concatenate(outs, axis=1), h


def _init_params(key, input_size, e_hidden, d_hidden):
    """Deterministic synthetic init (PyTorch-like scales, not a checkpoint)."""
    ks = jax.random.split(key, 8)

    def lin(k, fan_in, fan_out):
        bound = 1.0 / jnp.sqrt(fan_in)
        kw, kb = jax.random.split(k)
        w = jax.random.uniform(kw, (fan_in, fan_out), jnp.float32, -bound, bound)
        b = jax.random.uniform(kb, (1, fan_out), jnp.float32, -bound, bound)
        return w, b

    we0, be0 = lin(ks[0], input_size, e_hidden[0])         # eLinear0
    we1, be1 = lin(ks[1], e_hidden[0], e_hidden[1])        # eLinear1
    wh = jax.random.normal(ks[2], (e_hidden[-1], e_hidden[-1]), jnp.float32)
    bh = jnp.zeros((1, e_hidden[-1]), jnp.float32)         # hidden_bias init zeros
    wd0, bd0 = lin(ks[3], d_hidden[0], d_hidden[1])        # dLinear0
    wd1, bd1 = lin(ks[4], d_hidden[-1], input_size)        # dLinear1
    return (we0, be0, we1, be1, wh, bh, wd0, bd0, wd1, bd1)


if __name__ == "__main__":
    # Small shapes consistent with the module: x is (B, T, H*W), H*W = 4*4 = 16.
    B, T, D = 16, 8, 16
    e_hidden = [32, 32]
    d_hidden = [32, 32]
    H = e_hidden[-1]

    key = jax.random.PRNGKey(0)
    kx, ks, kp = jax.random.split(key, 3)
    x = (jax.random.uniform(kx, (B, T, D)) > 0.5).astype(jnp.float32)
    pre_spikes = (jax.random.uniform(ks, (B, H)) > 0.5).astype(jnp.float32)
    params = _init_params(kp, D, e_hidden, d_hidden)

    ref_out, ref_h = _ref_forward(x, pre_spikes, params)

    # Default single-block path (grid=(1,)) — the right config on v5e/v6e.
    outputs, h = rbae_forward(x, pre_spikes, params)
    outputs, h = jax.block_until_ready((outputs, h))
    assert outputs.shape == (B, T, D) and h.shape == (B, H)
    assert jnp.allclose(outputs, ref_out, rtol=1e-5, atol=1e-5)
    assert jnp.allclose(h, ref_h, rtol=1e-5, atol=1e-5)

    # Batch-blocked path (grid=(2,)) — the v7x two-TensorCore configuration;
    # also locks in the roll+mask correctness across block boundaries.
    outputs2, h2 = rbae_forward(x, pre_spikes, params, batch_block=B // 2)
    outputs2, h2 = jax.block_until_ready((outputs2, h2))
    assert jnp.allclose(outputs2, ref_out, rtol=1e-5, atol=1e-5)
    assert jnp.allclose(h2, ref_h, rtol=1e-5, atol=1e-5)

    # TODO(synk): forward2's stochastic spiking path (mem_update noise +
    # ActFun threshold + refractory masking) is not exercised by forward();
    # it would need pltpu.prng_* in-kernel and is intentionally not modeled.

    print("KERNEL_OK")
</pallas_src>

<mosaic_0001>
module attributes {stable_mosaic.version = 11 : i64} {
  func.func @_rbae_kernel(%arg0: i32, %arg1: memref<128x16xf32, #tpu.memory_space<vmem>>, %arg2: memref<16x32xf32, #tpu.memory_space<vmem>>, %arg3: memref<16x32xf32, #tpu.memory_space<vmem>>, %arg4: memref<1x32xf32, #tpu.memory_space<vmem>>, %arg5: memref<32x32xf32, #tpu.memory_space<vmem>>, %arg6: memref<1x32xf32, #tpu.memory_space<vmem>>, %arg7: memref<32x32xf32, #tpu.memory_space<vmem>>, %arg8: memref<1x32xf32, #tpu.memory_space<vmem>>, %arg9: memref<32x32xf32, #tpu.memory_space<vmem>>, %arg10: memref<1x32xf32, #tpu.memory_space<vmem>>, %arg11: memref<32x16xf32, #tpu.memory_space<vmem>>, %arg12: memref<1x16xf32, #tpu.memory_space<vmem>>, %arg13: memref<128x16xf32, #tpu.memory_space<vmem>>, %arg14: memref<16x32xf32, #tpu.memory_space<vmem>>, %arg15: memref<128x32xf32, #tpu.memory_space<vmem>>) attributes {dimension_semantics = [#tpu.dimension_semantics<parallel>], iteration_bounds = array<i64: 1>, scalar_prefetch = 0 : i64, scratch_operands = 1 : i64, tpu.core_type = #tpu.core_type<tc>, window_params = [{transform_indices = @transform_0, window_bounds = array<i64: 128, 16>}, {transform_indices = @transform_1, window_bounds = array<i64: 16, 32>}, {pipeline_mode = #tpu.pipeline_mode<synchronous>, transform_indices = @transform_2, window_bounds = array<i64: 16, 32>}, {pipeline_mode = #tpu.pipeline_mode<synchronous>, transform_indices = @transform_3, window_bounds = array<i64: 1, 32>}, {pipeline_mode = #tpu.pipeline_mode<synchronous>, transform_indices = @transform_4, window_bounds = array<i64: 32, 32>}, {pipeline_mode = #tpu.pipeline_mode<synchronous>, transform_indices = @transform_5, window_bounds = array<i64: 1, 32>}, {pipeline_mode = #tpu.pipeline_mode<synchronous>, transform_indices = @transform_6, window_bounds = array<i64: 32, 32>}, {pipeline_mode = #tpu.pipeline_mode<synchronous>, transform_indices = @transform_7, window_bounds = array<i64: 1, 32>}, {pipeline_mode = #tpu.pipeline_mode<synchronous>, transform_indices = @transform_8, window_bounds = array<i64: 32, 32>}, {pipeline_mode = #tpu.pipeline_mode<synchronous>, transform_indices = @transform_9, window_bounds = array<i64: 1, 32>}, {pipeline_mode = #tpu.pipeline_mode<synchronous>, transform_indices = @transform_10, window_bounds = array<i64: 32, 16>}, {pipeline_mode = #tpu.pipeline_mode<synchronous>, transform_indices = @transform_11, window_bounds = array<i64: 1, 16>}, {transform_indices = @transform_12, window_bounds = array<i64: 128, 16>}, {transform_indices = @transform_13, window_bounds = array<i64: 16, 32>}]} {
    %c0 = arith.constant 0 : index
    %c0_0 = arith.constant 0 : index
    %0 = vector.load %arg1[%c0, %c0_0] : memref<128x16xf32, #tpu.memory_space<vmem>>, vector<128x16xf32>
    %c0_1 = arith.constant 0 : index
    %c0_2 = arith.constant 0 : index
    %1 = vector.load %arg3[%c0_1, %c0_2] : memref<16x32xf32, #tpu.memory_space<vmem>>, vector<16x32xf32>
    %cst = arith.constant dense<0.000000e+00> : vector<128x32xf32>
    %2 = tpu.matmul %0, %1, %cst {dimension_numbers = #tpu.dot_dimension_numbers<[1], [0], [0], [1], [0, 0, 1, 1], [], []>} : vector<128x16xf32>, vector<16x32xf32>, vector<128x32xf32> -> vector<128x32xf32>
    %c0_3 = arith.constant 0 : index
    %c0_4 = arith.constant 0 : index
    %3 = vector.load %arg4[%c0_3, %c0_4] : memref<1x32xf32, #tpu.memory_space<vmem>>, vector<1x32xf32>
    %4 = vector.broadcast %3 : vector<1x32xf32> to vector<128x32xf32>
    %5 = arith.addf %2, %4 : vector<128x32xf32>
    %cst_5 = arith.constant 0.000000e+00 : f32
    %6 = vector.broadcast %cst_5 : f32 to vector<128x32xf32>
    %7 = arith.maximumf %5, %6 : vector<128x32xf32>
    %c0_6 = arith.constant 0 : index
    %c0_7 = arith.constant 0 : index
    %8 = vector.load %arg5[%c0_6, %c0_7] : memref<32x32xf32, #tpu.memory_space<vmem>>, vector<32x32xf32>
    %cst_8 = arith.constant dense<0.000000e+00> : vector<128x32xf32>
    %9 = tpu.matmul %7, %8, %cst_8 {dimension_numbers = #tpu.dot_dimension_numbers<[1], [0], [0], [1], [0, 0, 1, 1], [], []>} : vector<128x32xf32>, vector<32x32xf32>, vector<128x32xf32> -> vector<128x32xf32>
    %c0_9 = arith.constant 0 : index
    %c0_10 = arith.constant 0 : index
    %10 = vector.load %arg6[%c0_9, %c0_10] : memref<1x32xf32, #tpu.memory_space<vmem>>, vector<1x32xf32>
    %11 = vector.broadcast %10 : vector<1x32xf32> to vector<128x32xf32>
    %12 = arith.addf %9, %11 : vector<128x32xf32>
    %13 = arith.negf %12 : vector<128x32xf32>
    %14 = math.exp %13 : vector<128x32xf32>
    %cst_11 = arith.constant 1.000000e+00 : f32
    %15 = vector.broadcast %cst_11 : f32 to vector<128x32xf32>
    %16 = arith.addf %15, %14 : vector<128x32xf32>
    %17 = arith.divf %15, %16 : vector<128x32xf32>
    %c0_12 = arith.constant 0 : index
    %c0_13 = arith.constant 0 : index
    %18 = vector.load %arg15[%c0_12, %c0_13] : memref<128x32xf32, #tpu.memory_space<vmem>>, vector<128x32xf32>
    tpu.vector_store %arg15[%c0_12, %c0_13], %17 {strides = array<i32>} : memref<128x32xf32, #tpu.memory_space<vmem>>, vector<128x32xf32>,
    %c1_i32 = arith.constant 1 : i32
    %19 = tpu.dynamic_rotate %17 by %c1_i32 dim 0 : vector<128x32xf32>, i32 -> vector<128x32xf32>
    %c0_14 = arith.constant 0 : index
    %c0_15 = arith.constant 0 : index
    %20 = vector.load %arg2[%c0_14, %c0_15] : memref<16x32xf32, #tpu.memory_space<vmem>>, vector<16x32xf32>
    %21 = vector.shape_cast %20 : vector<16x32xf32> to vector<16x1x32xf32>
    %22 = vector.shape_cast %21 : vector<16x1x32xf32> to vector<16x1x32xf32>
    %23 = vector.broadcast %22 : vector<16x1x32xf32> to vector<16x8x32xf32>
    %24 = vector.shape_cast %23 : vector<16x8x32xf32> to vector<128x32xf32>
    %25 = tpu.iota {dimensions = array<i32: 0>} : vector<128x32xi32>
    %c7_i32 = arith.constant 7 : i32
    %26 = vector.broadcast %c7_i32 : i32 to vector<128x32xi32>
    %27 = arith.andi %25, %26 : vector<128x32xi32>
    %c0_i32 = arith.constant 0 : i32
    %28 = vector.broadcast %c0_i32 : i32 to vector<128x32xi32>
    %29 = arith.cmpi eq, %27, %28 : vector<128x32xi32>
    %30 = arith.select %29, %24, %19 : vector<128x32xi1>, vector<128x32xf32>
    %c0_16 = arith.constant 0 : index
    %c0_17 = arith.constant 0 : index
    %31 = vector.load %arg7[%c0_16, %c0_17] : memref<32x32xf32, #tpu.memory_space<vmem>>, vector<32x32xf32>
    %cst_18 = arith.constant dense<0.000000e+00> : vector<128x32xf32>
    %32 = tpu.matmul %30, %31, %cst_18 {dimension_numbers = #tpu.dot_dimension_numbers<[1], [0], [0], [1], [0, 0, 1, 1], [], []>} : vector<128x32xf32>, vector<32x32xf32>, vector<128x32xf32> -> vector<128x32xf32>
    %33 = arith.addf %32, %17 : vector<128x32xf32>
    %c0_19 = arith.constant 0 : index
    %c0_20 = arith.constant 0 : index
    %34 = vector.load %arg8[%c0_19, %c0_20] : memref<1x32xf32, #tpu.memory_space<vmem>>, vector<1x32xf32>
    %35 = vector.broadcast %34 : vector<1x32xf32> to vector<128x32xf32>
    %36 = arith.addf %33, %35 : vector<128x32xf32>
    %37 = arith.negf %36 : vector<128x32xf32>
    %38 = math.exp %37 : vector<128x32xf32>
    %cst_21 = arith.constant 1.000000e+00 : f32
    %39 = vector.broadcast %cst_21 : f32 to vector<128x32xf32>
    %40 = arith.addf %39, %38 : vector<128x32xf32>
    %41 = arith.divf %39, %40 : vector<128x32xf32>
    %c0_22 = arith.constant 0 : index
    %c0_23 = arith.constant 0 : index
    %42 = vector.load %arg9[%c0_22, %c0_23] : memref<32x32xf32, #tpu.memory_space<vmem>>, vector<32x32xf32>
    %cst_24 = arith.constant dense<0.000000e+00> : vector<128x32xf32>
    %43 = tpu.matmul %41, %42, %cst_24 {dimension_numbers = #tpu.dot_dimension_numbers<[1], [0], [0], [1], [0, 0, 1, 1], [], []>} : vector<128x32xf32>, vector<32x32xf32>, vector<128x32xf32> -> vector<128x32xf32>
    %c0_25 = arith.constant 0 : index
    %c0_26 = arith.constant 0 : index
    %44 = vector.load %arg10[%c0_25, %c0_26] : memref<1x32xf32, #tpu.memory_space<vmem>>, vector<1x32xf32>
    %45 = vector.broadcast %44 : vector<1x32xf32> to vector<128x32xf32>
    %46 = arith.addf %43, %45 : vector<128x32xf32>
    %cst_27 = arith.constant 0.000000e+00 : f32
    %47 = vector.broadcast %cst_27 : f32 to vector<128x32xf32>
    %48 = arith.maximumf %46, %47 : vector<128x32xf32>
    %c0_28 = arith.constant 0 : index
    %c0_29 = arith.constant 0 : index
    %49 = vector.load %arg11[%c0_28, %c0_29] : memref<32x16xf32, #tpu.memory_space<vmem>>, vector<32x16xf32>
    %cst_30 = arith.constant dense<0.000000e+00> : vector<128x16xf32>
    %50 = tpu.matmul %48, %49, %cst_30 {dimension_numbers = #tpu.dot_dimension_numbers<[1], [0], [0], [1], [0, 0, 1, 1], [], []>} : vector<128x32xf32>, vector<32x16xf32>, vector<128x16xf32> -> vector<128x16xf32>
    %c0_31 = arith.constant 0 : index
    %c0_32 = arith.constant 0 : index
    %51 = vector.load %arg12[%c0_31, %c0_32] : memref<1x16xf32, #tpu.memory_space<vmem>>, vector<1x16xf32>
    %52 = vector.broadcast %51 : vector<1x16xf32> to vector<128x16xf32>
    %53 = arith.addf %50, %52 : vector<128x16xf32>
    %54 = arith.negf %53 : vector<128x16xf32>
    %55 = math.exp %54 : vector<128x16xf32>
    %cst_33 = arith.constant 1.000000e+00 : f32
    %56 = vector.broadcast %cst_33 : f32 to vector<128x16xf32>
    %57 = arith.addf %56, %55 : vector<128x16xf32>
    %58 = arith.divf %56, %57 : vector<128x16xf32>
    %c0_34 = arith.constant 0 : index
    %c0_35 = arith.constant 0 : index
    %59 = vector.load %arg13[%c0_34, %c0_35] : memref<128x16xf32, #tpu.memory_space<vmem>>, vector<128x16xf32>
    tpu.vector_store %arg13[%c0_34, %c0_35], %58 {strides = array<i32>} : memref<128x16xf32, #tpu.memory_space<vmem>>, vector<128x16xf32>,
    %c7 = arith.constant 7 : index
    %c0_36 = arith.constant 0 : index
    %60 = tpu.strided_load %arg15[%c7, %c0_36] {strides = array<i32: 8, 1>} : memref<128x32xf32, #tpu.memory_space<vmem>>, vector<16x32xf32>
    %c0_37 = arith.constant 0 : index
    %c0_38 = arith.constant 0 : index
    %61 = vector.load %arg14[%c0_37, %c0_38] : memref<16x32xf32, #tpu.memory_space<vmem>>, vector<16x32xf32>
    tpu.vector_store %arg14[%c0_37, %c0_38], %60 {strides = array<i32>} : memref<16x32xf32, #tpu.memory_space<vmem>>, vector<16x32xf32>,
    return
  }
  func.func @transform_0(%arg0: i32) -> (i32, i32) {
    %c0_i32 = arith.constant 0 : i32
    %c0_i32_0 = arith.constant 0 : i32
    return %arg0, %c0_i32 : i32, i32
  }
  func.func @transform_1(%arg0: i32) -> (i32, i32) {
    %c0_i32 = arith.constant 0 : i32
    %c0_i32_0 = arith.constant 0 : i32
    return %arg0, %c0_i32 : i32, i32
  }
  func.func @transform_2(%arg0: i32) -> (i32, i32) {
    %c0_i32 = arith.constant 0 : i32
    %c0_i32_0 = arith.constant 0 : i32
    %c0_i32_1 = arith.constant 0 : i32
    return %c0_i32, %c0_i32_0 : i32, i32
  }
  func.func @transform_3(%arg0: i32) -> (i32, i32) {
    %c0_i32 = arith.constant 0 : i32
    %c0_i32_0 = arith.constant 0 : i32
    %c0_i32_1 = arith.constant 0 : i32
    return %c0_i32, %c0_i32_0 : i32, i32
  }
  func.func @transform_4(%arg0: i32) -> (i32, i32) {
    %c0_i32 = arith.constant 0 : i32
    %c0_i32_0 = arith.constant 0 : i32
    %c0_i32_1 = arith.constant 0 : i32
    return %c0_i32, %c0_i32_0 : i32, i32
  }
  func.func @transform_5(%arg0: i32) -> (i32, i32) {
    %c0_i32 = arith.constant 0 : i32
    %c0_i32_0 = arith.constant 0 : i32
    %c0_i32_1 = arith.constant 0 : i32
    return %c0_i32, %c0_i32_0 : i32, i32
  }
  func.func @transform_6(%arg0: i32) -> (i32, i32) {
    %c0_i32 = arith.constant 0 : i32
    %c0_i32_0 = arith.constant 0 : i32
    %c0_i32_1 = arith.constant 0 : i32
    return %c0_i32, %c0_i32_0 : i32, i32
  }
  func.func @transform_7(%arg0: i32) -> (i32, i32) {
    %c0_i32 = arith.constant 0 : i32
    %c0_i32_0 = arith.constant 0 : i32
    %c0_i32_1 = arith.constant 0 : i32
    return %c0_i32, %c0_i32_0 : i32, i32
  }
  func.func @transform_8(%arg0: i32) -> (i32, i32) {
    %c0_i32 = arith.constant 0 : i32
    %c0_i32_0 = arith.constant 0 : i32
    %c0_i32_1 = arith.constant 0 : i32
    return %c0_i32, %c0_i32_0 : i32, i32
  }
  func.func @transform_9(%arg0: i32) -> (i32, i32) {
    %c0_i32 = arith.constant 0 : i32
    %c0_i32_0 = arith.constant 0 : i32
    %c0_i32_1 = arith.constant 0 : i32
    return %c0_i32, %c0_i32_0 : i32, i32
  }
  func.func @transform_10(%arg0: i32) -> (i32, i32) {
    %c0_i32 = arith.constant 0 : i32
    %c0_i32_0 = arith.constant 0 : i32
    %c0_i32_1 = arith.constant 0 : i32
    return %c0_i32, %c0_i32_0 : i32, i32
  }
  func.func @transform_11(%arg0: i32) -> (i32, i32) {
    %c0_i32 = arith.constant 0 : i32
    %c0_i32_0 = arith.constant 0 : i32
    %c0_i32_1 = arith.constant 0 : i32
    return %c0_i32, %c0_i32_0 : i32, i32
  }
  func.func @transform_12(%arg0: i32) -> (i32, i32) {
    %c0_i32 = arith.constant 0 : i32
    %c0_i32_0 = arith.constant 0 : i32
    return %arg0, %c0_i32 : i32, i32
  }
  func.func @transform_13(%arg0: i32) -> (i32, i32) {
    %c0_i32 = arith.constant 0 : i32
    %c0_i32_0 = arith.constant 0 : i32
    return %arg0, %c0_i32 : i32, i32
  }
}

</mosaic_0001>

<bundles_post_ra>
// kernel: rbae_forward.1
= control target key start
LH: loop header
LB: loop body
LE: loop exit
PB: predicated region body
PF: predicated region fallthrough
CT: control target
= control target key end

     0   :  { %19 = vsyncpa [#allocation4], 0  ;;  %s3280_s0 = inlined_call_operand.hbm [shape: f32[128,16], index: 0, kind: input, shape index: {}]   ;;  %s3281_s1 = inlined_call_operand.hbm [shape: f32[16,32], index: 1, kind: input, shape index: {}]   ;;  %s3282_s2 = inlined_call_operand.hbm [shape: f32[16,32], index: 2, kind: input, shape index: {}]   ;;  %s3283_s3 = inlined_call_operand.vmem [shape: f32[1,32], index: 3, kind: input, shape index: {}]   ;;  %s3284_s4 = inlined_call_operand.vmem [shape: f32[32,32], index: 4, kind: input, shape index: {}]   ;;  %s3285_s5 = inlined_call_operand.vmem [shape: f32[1,32], index: 5, kind: input, shape index: {}]   ;;  %s3286_s6 = inlined_call_operand.vmem [shape: f32[32,32], index: 6, kind: input, shape index: {}]   ;;  %s3287_s7 = inlined_call_operand.hbm [shape: f32[1,32], index: 7, kind: input, shape index: {}]   ;;  %s3288_s8 = inlined_call_operand.hbm [shape: f32[32,32], index: 8, kind: input, shape index: {}]   ;;  %s3289_s9 = inlined_call_operand.vmem [shape: f32[1,32], index: 9, kind: input, shape index: {}]   ;;  %s3290_s10 = inlined_call_operand.vmem [shape: f32[32,16], index: 10, kind: input, shape index: {}]   ;;  %s3291_s11 = inlined_call_operand.vmem [shape: f32[1,16], index: 11, kind: input, shape index: {}]   ;;  %s3292_s12 = inlined_call_operand.hbm [shape: f32[128,16], index: 12, kind: output, shape index: {0}]   ;;  %s3293_s13 = inlined_call_operand.hbm [shape: f32[16,32], index: 13, kind: output, shape index: {1}]  }
   0x1   :  { %20 = vsyncpa [#allocation7], 0 }
   0x2   :  { %21 = vsyncpa [#allocation10], 0 }
   0x3   :  { %22 = vsyncpa [#allocation5], 0 }
   0x4   :  { %23 = vsyncpa [#allocation14], 0  ;;  %s2633_s25 = smov [#allocation6]   ;;  %s2634_s27 = smov [#allocation9]  }
   0x5   :  { %s41_s26 = sshll.u32 %s2633_s25, 4  ;;  %s74_s28 = sshll.u32 %s2634_s27, 4  ;;  %s42_s26 = int_to_ptr.vmem [resolvable:$true] %s41_s26  ;;  %s2713_s28 = int_to_ptr.vmem [resolvable:$true] %s74_s28 }
   0x6   :  { %s2469_s14 = scalar_lea.hbm %s3281_s1, 256 }
   0x7   :  { %p2470_p0 = scmp.ne.s32.totalorder %s3281_s1, %s2469_s14  ;;  %p2473_p1 = scmp.lt.u32.totalorder %s2469_s14, %s3281_s1 }
   0x9   :  { %p2475_p2 = pnand %p2473_p1, %p2470_p0 }
   0xb   :  { %2478 = shalt.err (!%p2475_p2)
}
   0xc   :  { %s2479_s19 = scalar_lea.vmem %s42_s26, 256  ;;  %p2484_p4 = scmp.lt.s32.totalorder %s42_s26, %s42_s26 }
   0xd   :  { %p2480_p3 = scmp.ne.s32.totalorder %s42_s26, %s2479_s19  ;;  %p2485_p5 = scmp.lt.s32.totalorder %s2479_s19, %s2479_s19 }
   0xf   :  { %p2486_p6 = por %p2485_p5, %p2484_p4 }
  0x11   :  { %p2487_p7 = pnand %p2486_p6, %p2480_p3 }
  0x13   :  { %2490 = shalt.err (!%p2487_p7)
}
  0x14   :  { %s2635_s20 = smov 128   ;;  %s2636_s21 = smov 8  }
  0x15   :  { %47 = dma.hbm_to_vmem [thread:$0]  %s3281_s1, 256, %s42_s26, [#allocation7], %s2635_s20, %s2635_s20, %s2636_s21  }
  0x16   :  { %s2491_s27 = scalar_lea.hbm %s3287_s7, 16 }
  0x17   :  { %p2492_p8 = scmp.ne.s32.totalorder %s3287_s7, %s2491_s27  ;;  %p2495_p9 = scmp.lt.u32.totalorder %s2491_s27, %s3287_s7 }
  0x19   :  { %p2497_p10 = pnand %p2495_p9, %p2492_p8 }
  0x1b   :  { %2500 = shalt.err (!%p2497_p10)
}
  0x1c   :  { %s2501_s16 = scalar_lea.vmem %s2713_s28, 16  ;;  %s2505_s1 = scalar_lea.vmem %s2713_s28, 32 }
  0x1d   :  { %p2502_p11 = scmp.ne.s32.totalorder %s2713_s28, %s2501_s16  ;;  %p2506_p12 = scmp.lt.s32.totalorder %s2713_s28, %s2713_s28 }
  0x1e   :  { %p2507_p13 = scmp.lt.s32.totalorder %s2505_s1, %s2501_s16 }
  0x20   :  { %p2508_p0 = por %p2507_p13, %p2506_p12 }
  0x22   :  { %p2509_p1 = pnand %p2508_p0, %p2502_p11 }
  0x24   :  { %2512 = shalt.err (!%p2509_p1)
}
  0x25   :  { %77 = dma.hbm_to_vmem [thread:$0]  %s3287_s7, 16, %s2713_s28, [#allocation10]  }
  0x26   :  { %s2637_s18 = smov [#allocation3]   ;;  %s2638_s22 = smov [#allocation8]  }
  0x27   :  { %s29_s19 = sshll.u32 %s2637_s18, 4  ;;  %s53_s23 = sshll.u32 %s2638_s22, 4  ;;  %s30_s19 = int_to_ptr.vmem [resolvable:$true] %s29_s19  ;;  %s2748_s23 = int_to_ptr.vmem [resolvable:$true] %s53_s23 }
  0x28   :  { %s2513_s27 = scalar_lea.hbm %s3280_s0, 2048 }
  0x29   :  { %p2514_p2 = scmp.ne.s32.totalorder %s3280_s0, %s2513_s27  ;;  %p2517_p3 = scmp.lt.u32.totalorder %s2513_s27, %s3280_s0 }
  0x2b   :  { %p2519_p4 = pnand %p2517_p3, %p2514_p2 }
  0x2d   :  { %2522 = shalt.err (!%p2519_p4)
}
  0x2e   :  { %s2523_s7 = scalar_lea.vmem %s30_s19, 2048  ;;  %p2528_p6 = scmp.lt.s32.totalorder %s30_s19, %s30_s19 }
  0x2f   :  { %p2524_p5 = scmp.ne.s32.totalorder %s30_s19, %s2523_s7  ;;  %p2529_p7 = scmp.lt.s32.totalorder %s2523_s7, %s2523_s7 }
  0x31   :  { %p2530_p8 = por %p2529_p7, %p2528_p6 }
  0x33   :  { %p2531_p9 = pnand %p2530_p8, %p2524_p5 }
  0x35   :  { %2534 = shalt.err (!%p2531_p9)
}
  0x36   :  { %35 = dma.hbm_to_vmem [thread:$0]  %s3280_s0, 2048, %s30_s19, [#allocation4], %s2635_s20, %s2635_s20, %s2636_s21  }
  0x37   :  { %s2535_s17 = scalar_lea.hbm %s3282_s2, 256 }
  0x38   :  { %p2536_p10 = scmp.ne.s32.totalorder %s3282_s2, %s2535_s17  ;;  %p2539_p11 = scmp.lt.u32.totalorder %s2535_s17, %s3282_s2 }
  0x3a   :  { %p2541_p12 = pnand %p2539_p11, %p2536_p10 }
  0x3c   :  { %2544 = shalt.err (!%p2541_p12)
}
  0x3d   :  { %s2545_s27 = scalar_lea.vmem %s2748_s23, 256  ;;  %p2550_p0 = scmp.lt.s32.totalorder %s2748_s23, %s2748_s23 }
  0x3e   :  { %p2546_p13 = scmp.ne.s32.totalorder %s2748_s23, %s2545_s27  ;;  %p2551_p1 = scmp.lt.s32.totalorder %s2545_s27, %s2545_s27 }
  0x40   :  { %p2552_p2 = por %p2551_p1, %p2550_p0 }
  0x42   :  { %p2553_p3 = pnand %p2552_p2, %p2546_p13 }
  0x44   :  { %2556 = shalt.err (!%p2553_p3)
}
  0x45   :  { %59 = dma.hbm_to_vmem [thread:$0]  %s3282_s2, 256, %s2748_s23, [#allocation7], %s2635_s20, %s2635_s20, %s2636_s21  }
  0x46   :  { %s2639_s29 = smov [#allocation11]   ;;  %s2557_s7 = scalar_lea.hbm %s3288_s8, 512 }
  0x47   :  { %s83_s30 = sshll.u32 %s2639_s29, 4  ;;  %p2558_p4 = scmp.ne.s32.totalorder %s3288_s8, %s2557_s7  ;;  %s84_s30 = int_to_ptr.vmem [resolvable:$true] %s83_s30 }
  0x48   :  { %p2561_p5 = scmp.lt.u32.totalorder %s2557_s7, %s3288_s8 }
  0x4a   :  { %p2563_p6 = pnand %p2561_p5, %p2558_p4 }
  0x4c   :  { %2566 = shalt.err (!%p2563_p6)
}
  0x4d   :  { %s2567_s17 = scalar_lea.vmem %s84_s30, 512  ;;  %p2572_p8 = scmp.lt.s32.totalorder %s84_s30, %s84_s30 }
  0x4e   :  { %p2568_p7 = scmp.ne.s32.totalorder %s84_s30, %s2567_s17  ;;  %p2573_p9 = scmp.lt.s32.totalorder %s2567_s17, %s2567_s17 }
  0x50   :  { %p2574_p10 = por %p2573_p9, %p2572_p8 }
  0x52   :  { %p2575_p11 = pnand %p2574_p10, %p2568_p7 }
  0x54   :  { %2578 = shalt.err (!%p2575_p11)
}
  0x55   :  { %89 = dma.hbm_to_vmem [thread:$0]  %s3288_s8, 512, %s84_s30, [#allocation10], %s2635_s20, %s2635_s20, %s2636_s21  }
  0x56   :  { %2623 = dma.done.wait [#allocation4], 2048  }
  0x57   :  { %2624 = vsyncadd [#allocation4], 4294965248 }
  0x58   :  { %2625 = dma.done.wait [#allocation7], 512  }
  0x59   :  { %2626 = vsyncadd [#allocation7], 4294966784 }
  0x5a   :  { %2627 = dma.done.wait [#allocation10], 528  }
  0x5b   :  { %2628 = vsyncadd [#allocation10], 4294966768  ;;  %vm136_vm0 = vcmask 130048   ;;  %v127_v0 = vld [vmem:[#allocation8] sm:$0xff]  ;;  %v128_v1 = vld [vmem:[#allocation8 + $0x8] sm:$0xff]  ;;  %vm357_vm1 = vcmask 261120  }
  0x5c   :  { %v111_v2 = vld [vmem:[#allocation3] sm:$0xff]  ;;  %v2227_v3 = vpack.c.bf16 %v128_v1, %v127_v0  ;;  %v112_v5 = vld [vmem:[#allocation3 + $0x8] sm:$0xff]  ;;  %v113_v7 = vld [vmem:[#allocation3 + $0x10] sm:$0xff] }
  0x5d   :  { %2075 = vmatprep.mubr.msk.f32.mxu0 %vm136_vm0, %v111_v2  ;;  %v119_v4 = vld [vmem:[#allocation3 + $0x40] sm:$0xff]  ;;  %v120_v6 = vld [vmem:[#allocation3 + $0x48] sm:$0xff]  ;;  %v121_v8 = vld [vmem:[#allocation3 + $0x50] sm:$0xff] }
  0x5e   :  { %2228 = vmatprep.subr.bf16.mxu0 %v2227_v3  ;;  %2263 = vmatprep.subr.bf16.mxu1 %v2227_v3  ;;  %v346_v9 = vld [vmem:[%s3284_s4] sm:$0xff]  ;;  %v347_v10 = vld [vmem:[%s3284_s4 + $0x8] sm:$0xff]  ;;  %v348_v11 = vld [vmem:[%s3284_s4 + $0x10] sm:$0xff] }
  0x5f   :  { %2230 = vmatpush3.bf16.msra.mxu0 %v2227_v3  ;;  %2264 = vmatpush3.bf16.msra.mxu1 %v2227_v3  ;;  %v2231_v12 = vpack.c.bf16 %v347_v10, %v346_v9  ;;  %v349_v13 = vld [vmem:[%s3284_s4 + $0x18] sm:$0xff]  ;;  %v115_v16 = vld [vmem:[#allocation3 + $0x20] sm:$0xff]  ;;  %v116_v19 = vld [vmem:[#allocation3 + $0x28] sm:$0xff] }
  0x60   :  { %2087 = vmatprep.mubr.msk.f32.mxu1 %vm136_vm0, %v119_v4  ;;  %v114_v14 = vld [vmem:[#allocation3 + $0x18] sm:$0xff]  ;;  %v123_v17 = vld [vmem:[#allocation3 + $0x60] sm:$0xff]  ;;  %v2235_v18 = vpack.c.bf16 %v349_v13, %v348_v11  ;;  %v124_v20 = vld [vmem:[#allocation3 + $0x68] sm:$0xff] }
  0x61   :  { %v122_v15 = vld [vmem:[#allocation3 + $0x58] sm:$0xff]  ;;  %2232 = vmatprep.subr.bf16.mxu1 %v2231_v12  ;;  %v117_v21 = vld [vmem:[#allocation3 + $0x30] sm:$0xff]  ;;  %v1840_v25 = vld [vmem:[%s3283_s3] ss:$0 sm:$0xff] }
  0x62   :  { %2076 = vmatmul.mubr.msk.f32.vlgmr.msra.gmra.mrb[0].mxu0 %vm136_vm0, %v112_v5  ;;  %2088 = vmatmul.mubr.msk.f32.vlgmr.msra.gmra.mrb[0].mxu1 %vm136_vm0, %v120_v6  ;;  %v125_v22 = vld [vmem:[#allocation3 + $0x70] sm:$0xff]  ;;  %v118_v23 = vld [vmem:[#allocation3 + $0x38] sm:$0xff]  ;;  %v943_v10 = vld [vmem:[%s3286_s6] sm:$0xff] }
  0x63   :  { %2078 = vmatprep.mubr.msk.f32.mxu0 %vm136_vm0, %v113_v7  ;;  %2090 = vmatprep.mubr.msk.f32.mxu1 %vm136_vm0, %v121_v8  ;;  %v126_v24 = vld [vmem:[#allocation3 + $0x78] sm:$0xff]  ;;  %v944_v11 = vld [vmem:[%s3286_s6 + $0x8] sm:$0xff]  ;;  %v945_v13 = vld [vmem:[%s3286_s6 + $0x10] sm:$0xff] }
  0x64   :  { %2234 = vmatpush3.bf16.msra.mxu1 %v2231_v12  ;;  %v2239_v12 = vpack.c.bf16 %v944_v11, %v943_v10 }
  0x65   :  { %2236 = vmatprep.subr.bf16.mxu1 %v2235_v18 }
  0x66   :  { %2079 = vmatmul.mubr.msk.f32.gmra.mrb[2].mxu0 %vm136_vm0, %v114_v14  ;;  %2091 = vmatmul.mubr.msk.f32.gmra.mrb[2].mxu1 %vm136_vm0, %v122_v15  ;;  %v946_v14 = vld [vmem:[%s3286_s6 + $0x18] sm:$0xff] }
  0x67   :  { %2081 = vmatprep.mubr.msk.f32.mxu0 %vm136_vm0, %v115_v16  ;;  %2093 = vmatprep.mubr.msk.f32.mxu1 %vm136_vm0, %v123_v17  ;;  %v2243_v15 = vpack.c.bf16 %v946_v14, %v945_v13  ;;  %v2862_v16 = vld [vmem:[%s3285_s5] ss:$0 sm:$0xff] }
  0x68   :  { %2238 = vmatpush3.bf16.msra.mxu1 %v2235_v18  ;;  %2240 = vmatprep.subr.bf16.mxu0 %v2239_v12 }
  0x69   :  { %2242 = vmatpush3.bf16.msra.mxu0 %v2239_v12 }
  0x6a   :  { %2082 = vmatmul.mubr.msk.f32.gmra.mrb[4].mxu0 %vm136_vm0, %v116_v19  ;;  %2094 = vmatmul.mubr.msk.f32.gmra.mrb[4].mxu1 %vm136_vm0, %v124_v20 }
  0x6b   :  { %2084 = vmatprep.mubr.msk.f32.mxu0 %vm136_vm0, %v117_v21  ;;  %2096 = vmatprep.mubr.msk.f32.mxu1 %vm136_vm0, %v125_v22 }
  0x6c   :  { %2244 = vmatprep.subr.bf16.mxu0 %v2243_v15 }
  0x6d   :  { %2246 = vmatpush3.bf16.msra.mxu0 %v2243_v15 }
  0x6e   :  { %2085 = vmatmul.mubr.msk.f32.gmra.mrb[6].mxu0 %vm136_vm0, %v118_v23  ;;  %2097 = vmatmul.mubr.msk.f32.gmra.mrb[6].mxu1 %vm136_vm0, %v126_v24 }
 0x135   :  { %v2077_v26 = vpop.f32.mrb[0].mxu0  ;;  %v2089_v27 = vpop.f32.mrb[0].mxu1 }
 0x136   :  { %v257_v28 = vadd.f32 %v2077_v26, %v1840_v25  ;;  %v251_v29 = vpop.f32.mrb[1].mxu0  ;;  %v291_v30 = vpop.f32.mrb[1].mxu1  ;;  %v297_v61 = vadd.f32 %v2089_v27, %v1840_v25 }
 0x137   :  { %v252_v31 = vadd.f32 %v1840_v25, %v251_v29  ;;  %v292_v50 = vadd.f32 %v1840_v25, %v291_v30 }
 0x138   :  { %v331_v35 = vmax.f32 %v257_v28, 0.0  ;;  %v339_v0 = vmax.f32 %v297_v61, 0.0 }
 0x139   :  { %v330_v32 = vmax.f32 %v252_v31, 0.0  ;;  %v2080_v33 = vpop.f32.mrb[2].mxu0  ;;  %v2092_v34 = vpop.f32.mrb[2].mxu1  ;;  %v338_v58 = vmax.f32 %v292_v50, 0.0 }
 0x13a   :  { %v267_v36 = vadd.f32 %v2080_v33, %v1840_v25  ;;  %v261_v37 = vpop.f32.mrb[3].mxu0  ;;  %v301_v38 = vpop.f32.mrb[3].mxu1  ;;  %v307_v1 = vadd.f32 %v2092_v34, %v1840_v25 }
 0x13b   :  { %v262_v39 = vadd.f32 %v1840_v25, %v261_v37  ;;  %2107 = vmatprep.mubr.msk.f32.mxu1 %vm357_vm1, %v330_v32  ;;  %v302_v59 = vadd.f32 %v1840_v25, %v301_v38 }
 0x13c   :  { %2108 = vmatmul.mubr.msk.f32.vlgmr.msra.gmra.mrb[8].mxu1 %vm357_vm1, %v331_v35  ;;  %v333_v43 = vmax.f32 %v267_v36, 0.0  ;;  %v341_v4 = vmax.f32 %v307_v1, 0.0 }
 0x13d   :  { %v332_v40 = vmax.f32 %v262_v39, 0.0  ;;  %v2083_v41 = vpop.f32.mrb[4].mxu0  ;;  %v2095_v42 = vpop.f32.mrb[4].mxu1  ;;  %v340_v62 = vmax.f32 %v302_v59, 0.0 }
 0x13e   :  { %v277_v44 = vadd.f32 %v2083_v41, %v1840_v25  ;;  %v271_v45 = vpop.f32.mrb[5].mxu0  ;;  %v311_v46 = vpop.f32.mrb[5].mxu1  ;;  %v317_v5 = vadd.f32 %v2095_v42, %v1840_v25 }
 0x13f   :  { %v272_v47 = vadd.f32 %v1840_v25, %v271_v45  ;;  %2110 = vmatprep.mubr.msk.f32.mxu1 %vm357_vm1, %v332_v40  ;;  %v312_v63 = vadd.f32 %v1840_v25, %v311_v46 }
 0x140   :  { %2111 = vmatmul.mubr.msk.f32.gmra.mrb[10].mxu1 %vm357_vm1, %v333_v43  ;;  %v335_v52 = vmax.f32 %v277_v44, 0.0  ;;  %v343_v7 = vmax.f32 %v317_v5, 0.0 }
 0x141   :  { %v334_v48 = vmax.f32 %v272_v47, 0.0  ;;  %v2086_v49 = vpop.f32.mrb[6].mxu0  ;;  %v2098_v51 = vpop.f32.mrb[6].mxu1  ;;  %v342_v2 = vmax.f32 %v312_v63, 0.0 }
 0x142   :  { %v287_v53 = vadd.f32 %v2086_v49, %v1840_v25  ;;  %v281_v54 = vpop.f32.mrb[7].mxu0  ;;  %v321_v55 = vpop.f32.mrb[7].mxu1  ;;  %v327_v8 = vadd.f32 %v2098_v51, %v1840_v25 }
 0x143   :  { %v282_v56 = vadd.f32 %v1840_v25, %v281_v54  ;;  %2113 = vmatprep.mubr.msk.f32.mxu1 %vm357_vm1, %v334_v48  ;;  %v322_v3 = vadd.f32 %v1840_v25, %v321_v55 }
 0x144   :  { %2114 = vmatmul.mubr.msk.f32.gmra.mrb[12].mxu1 %vm357_vm1, %v335_v52  ;;  %v337_v60 = vmax.f32 %v287_v53, 0.0  ;;  %v345_v9 = vmax.f32 %v327_v8, 0.0 }
 0x145   :  { %v336_v57 = vmax.f32 %v282_v56, 0.0  ;;  %v344_v6 = vmax.f32 %v322_v3, 0.0 }
 0x147   :  { %2116 = vmatprep.mubr.msk.f32.mxu1 %vm357_vm1, %v336_v57 }
 0x148   :  { %2117 = vmatmul.mubr.msk.f32.gmra.mrb[14].mxu1 %vm357_vm1, %v337_v60 }
 0x149   :  { %2119 = vmatprep.mubr.msk.f32.mxu1 %vm357_vm1, %v338_v58 }
 0x14c   :  { %2120 = vmatmul.mubr.msk.f32.gmra.mrb[16].mxu1 %vm357_vm1, %v339_v0 }
 0x14d   :  { %2122 = vmatprep.mubr.msk.f32.mxu1 %vm357_vm1, %v340_v62 }
 0x150   :  { %2123 = vmatmul.mubr.msk.f32.gmra.mrb[18].mxu1 %vm357_vm1, %v341_v4 }
 0x151   :  { %2125 = vmatprep.mubr.msk.f32.mxu1 %vm357_vm1, %v342_v2 }
 0x154   :  { %2126 = vmatmul.mubr.msk.f32.gmra.mrb[20].mxu1 %vm357_vm1, %v343_v7 }
 0x155   :  { %2128 = vmatprep.mubr.msk.f32.mxu1 %vm357_vm1, %v344_v6 }
 0x158   :  { %2129 = vmatmul.mubr.msk.f32.gmra.mrb[22].mxu1 %vm357_vm1, %v345_v9 }
 0x20f   :  { %v2109_v17 = vpop.f32.mrb[8].mxu1 }
 0x210   :  { %v478_v18 = vadd.f32 %v2109_v17, %v2862_v16  ;;  %v472_v19 = vpop.f32.mrb[9].mxu1  ;;  %v679_v17 = vlaneseq }
 0x211   :  { %v473_v20 = vadd.f32 %v2862_v16, %v472_v19 }
 0x212   :  { %v1875_v21 = vmul.f32 -1.442695, %v478_v18 }
 0x213   :  { %v1874_v22 = vmul.f32 -1.442695, %v473_v20  ;;  %v2112_v23 = vpop.f32.mrb[10].mxu1 }
 0x214   :  { %2277 = vpow2.f32 %v1875_v21  ;;  %v488_v24 = vadd.f32 %v2112_v23, %v2862_v16  ;;  %v482_v25 = vpop.f32.mrb[11].mxu1  ;;  %v2640_v21 = vmov 1966171168  }
 0x215   :  { %2279 = vpow2.f32 %v1874_v22  ;;  %v483_v26 = vadd.f32 %v2862_v16, %v482_v25  ;;  %v704_v22 = vunpack.c.l.s4 %v2640_v21 }
 0x216   :  { %v1877_v27 = vmul.f32 -1.442695, %v488_v24 }
 0x217   :  { %v1876_v28 = vmul.f32 -1.442695, %v483_v26  ;;  %v2115_v29 = vpop.f32.mrb[12].mxu1 }
 0x218   :  { %2281 = vpow2.f32 %v1877_v27  ;;  %v498_v30 = vadd.f32 %v2115_v29, %v2862_v16  ;;  %v492_v31 = vpop.f32.mrb[13].mxu1  ;;  %v2896_v29 = vshrl.u32 %v679_v17, 7 }
 0x219   :  { %2283 = vpow2.f32 %v1876_v28  ;;  %v493_v32 = vadd.f32 %v2862_v16, %v492_v31 }
 0x21a   :  { %v1879_v33 = vmul.f32 -1.442695, %v498_v30  ;;  %v705_v30 = vunpack.c.0.s8 %v704_v22  ;;  %vm681_vm2 = vcmp.lt.s32.totalorder %v2896_v29, 1 }
 0x21b   :  { %v1878_v34 = vmul.f32 -1.442695, %v493_v32  ;;  %v2118_v35 = vpop.f32.mrb[14].mxu1 }
 0x21c   :  { %2285 = vpow2.f32 %v1879_v33  ;;  %v508_v36 = vadd.f32 %v2118_v35, %v2862_v16  ;;  %v502_v37 = vpop.f32.mrb[15].mxu1 }
 0x21d   :  { %2287 = vpow2.f32 %v1878_v34  ;;  %v503_v38 = vadd.f32 %v2862_v16, %v502_v37  ;;  %v2907_v37 = vsub.s32 %v705_v30, %v2896_v29 }
 0x21e   :  { %v2278_v39 = vpop.eup %2277  ;;  %v1881_v40 = vmul.f32 -1.442695, %v508_v36 }
 0x21f   :  { %v2280_v41 = vpop.eup %2279  ;;  %v600_v42 = vadd.f32 1.0, %v2278_v39  ;;  %v1880_v43 = vmul.f32 -1.442695, %v503_v38  ;;  %v2121_v44 = vpop.f32.mrb[16].mxu1 }
 0x220   :  { %v599_v45 = vadd.f32 1.0, %v2280_v41  ;;  %2289 = vpow2.f32 %v1881_v40  ;;  %v518_v46 = vadd.f32 %v2121_v44, %v2862_v16  ;;  %v512_v47 = vpop.f32.mrb[17].mxu1  ;;  %v698_v40 = vld [vmem:[#allocation6] sm:$0xff] }
 0x221   :  { %2291 = vrcp.f32 %v600_v42  ;;  %v513_v48 = vadd.f32 %v2862_v16, %v512_v47  ;;  %v709_v44 = vrot.slane %v698_v40, %v2907_v37 }
 0x222   :  { %v2282_v49 = vpop.eup %2281  ;;  %2293 = vrcp.f32 %v599_v45  ;;  %v1883_v50 = vmul.f32 -1.442695, %v518_v46 }
 0x223   :  { %v2284_v51 = vpop.eup %2283  ;;  %v602_v52 = vadd.f32 1.0, %v2282_v49  ;;  %2295 = vpow2.f32 %v1880_v43  ;;  %v1882_v53 = vmul.f32 -1.442695, %v513_v48  ;;  %v2124_v54 = vpop.f32.mrb[18].mxu1  ;;  %v702_v49 = vcombine.high %v698_v40, %v698_v40 }
 0x224   :  { %v601_v55 = vadd.f32 1.0, %v2284_v51  ;;  %2297 = vpow2.f32 %v1883_v50  ;;  %v528_v56 = vadd.f32 %v2124_v54, %v2862_v16  ;;  %v522_v57 = vpop.f32.mrb[19].mxu1  ;;  %v880_v54 = vadd.s32 8, %v2896_v29 }
 0x225   :  { %2299 = vrcp.f32 %v602_v52  ;;  %v523_v58 = vadd.f32 %v2862_v16, %v522_v57  ;;  %v717_v52 = vcombine.high %v709_v44, %v709_v44  ;;  %v2934_v57 = vsub.s32 0, %v2896_v29 }
 0x226   :  { %v2286_v59 = vpop.eup %2285  ;;  %2301 = vrcp.f32 %v601_v55  ;;  %v1885_v60 = vmul.f32 -1.442695, %v528_v56  ;;  %v725_v55 = vrot.slane %v709_v44, %v2907_v37  ;;  %v881_v56 = vadd.s32 16, %v2896_v29 }
 0x227   :  { %v2288_v61 = vpop.eup %2287  ;;  %v604_v62 = vadd.f32 1.0, %v2286_v59  ;;  %2303 = vpow2.f32 %v1882_v53  ;;  %v1884_v63 = vmul.f32 -1.442695, %v523_v58  ;;  %v2127_v0 = vpop.f32.mrb[20].mxu1  ;;  %v882_v58 = vadd.s32 24, %v2896_v29 }
 0x228   :  { %v603_v1 = vadd.f32 1.0, %v2288_v61  ;;  %2305 = vpow2.f32 %v1885_v60  ;;  %v538_v2 = vadd.f32 %v2127_v0, %v2862_v16  ;;  %v532_v3 = vpop.f32.mrb[21].mxu1  ;;  %v716_v59 = vrot.slane %v702_v49, %v2907_v37 }
 0x229   :  { %2307 = vrcp.f32 %v604_v62  ;;  %v533_v4 = vadd.f32 %v2862_v16, %v532_v3  ;;  %v739_v61 = vrot.slane %v717_v52, %v2907_v37  ;;  %v747_v3 = vcombine.high %v725_v55, %v725_v55 }
 0x22a   :  { %v2290_v5 = vpop.eup %2289  ;;  %2309 = vrcp.f32 %v603_v1  ;;  %v1887_v6 = vmul.f32 -1.442695, %v538_v2  ;;  %v896_v1 = vand.u32 7, %v880_v54  ;;  %v885_v44 = vadd.s32 48, %v2896_v29 }
 0x22b   :  { %v2878_v7 = vpop.eup %2291  ;;  %v606_v8 = vadd.f32 1.0, %v2290_v5  ;;  %2311 = vpow2.f32 %v1884_v63  ;;  %v1886_v9 = vmul.f32 -1.442695, %v533_v4  ;;  %v2130_v10 = vpop.f32.mrb[22].mxu1  ;;  %v897_v4 = vand.u32 7, %v881_v56 }
 0x22c   :  { %v2880_v11 = vpop.eup %2293  ;;  %648 = vst.msk [vmem:[#allocation2 + $0x8] sm:$0xff] %vm357_vm1, %v2878_v7  ;;  %2313 = vpow2.f32 %v1887_v6  ;;  %v548_v12 = vadd.f32 %v2130_v10, %v2862_v16  ;;  %v542_v13 = vpop.f32.mrb[23].mxu1  ;;  %v749_v5 = vcombine.high %v739_v61, %v739_v61  ;;  %v718_v10 = vcombine.high %v716_v59, %v716_v59 }
 0x22d   :  { %v2296_v14 = vpop.eup %2295  ;;  %647 = vst.msk [vmem:[#allocation2] sm:$0xff] %vm357_vm1, %v2880_v11  ;;  %2315 = vrcp.f32 %v606_v8  ;;  %v543_v15 = vadd.f32 %v2862_v16, %v542_v13  ;;  %v898_v8 = vand.u32 7, %v882_v58  ;;  %v807_v13 = vrot.slane %v739_v61, %v2934_v57 }
 0x22e   :  { %v2298_v18 = vpop.eup %2297  ;;  %v605_v19 = vadd.f32 1.0, %v2296_v14  ;;  %2317 = vpow2.f32 %v1886_v9  ;;  %v1889_v20 = vmul.f32 -1.442695, %v548_v12  ;;  %v883_v9 = vadd.s32 32, %v2896_v29 }
 0x22f   :  { %v2888_v23 = vpop.eup %2299  ;;  %v608_v24 = vadd.f32 1.0, %v2298_v18  ;;  %v1888_v25 = vmul.f32 -1.442695, %v543_v15  ;;  %v895_v12 = vand.u32 7, %v2896_v29  ;;  %v884_v14 = vadd.s32 40, %v2896_v29 }
 0x230   :  { %v2890_v26 = vpop.eup %2301  ;;  %650 = vst.msk [vmem:[#allocation2 + $0x18] sm:$0xff] %vm357_vm1, %v2888_v23  ;;  %2319 = vrcp.f32 %v605_v19  ;;  %v663_v15 = vrot.slane %v2880_v11, 7  ;;  %v664_v17 = vrot.slane %v2878_v7, 7  ;;  %vm2959_vm3 = vcmp.eq.s32.totalorder %v896_v1, 0 }
 0x231   :  { %v2304_v27 = vpop.eup %2303  ;;  %649 = vst.msk [vmem:[#allocation2 + $0x10] sm:$0xff] %vm357_vm1, %v2890_v26  ;;  %2321 = vrcp.f32 %v608_v24  ;;  %v732_v19 = vrot.slane %v716_v59, %v2907_v37  ;;  %v665_v21 = vrot.slane %v2890_v26, 7  ;;  %v811_v22 = vrot.slane %v747_v3, %v2934_v57 }
 0x232   :  { %v2306_v16 = vpop.eup %2305  ;;  %v607_v28 = vadd.f32 1.0, %v2304_v27  ;;  %2323 = vpow2.f32 %v1889_v20  ;;  %v2964_v20 = vld [vmem:[#allocation6 + $0x8] sm:$0xff]  ;;  %vm2968_vm4 = vcmp.eq.s32.totalorder %v897_v4, 0  ;;  %vm2976_vm5 = vcmp.eq.s32.totalorder %v898_v8, 0 }
 0x233   :  { %v2898_v31 = vpop.eup %2307  ;;  %v610_v32 = vadd.f32 1.0, %v2306_v16  ;;  %2325 = vpow2.f32 %v1888_v25  ;;  %v815_v25 = vrot.slane %v749_v5, %v2934_v57  ;;  %v803_v16 = vrot.slane %v725_v55, %v2934_v57 }
 0x234   :  { %v2900_v33 = vpop.eup %2309  ;;  %652 = vst.msk [vmem:[#allocation2 + $0x28] sm:$0xff] %vm357_vm1, %v2898_v31  ;;  %2327 = vrcp.f32 %v607_v28  ;;  %v899_v30 = vand.u32 7, %v883_v9  ;;  %vm911_vm6 = vcmp.eq.s32.totalorder %v895_v12, 0  ;;  %v696_v40 = vsel %vm681_vm2, %v663_v15, %v664_v17 }
 0x235   :  { %v2312_v34 = vpop.eup %2311  ;;  %651 = vst.msk [vmem:[#allocation2 + $0x20] sm:$0xff] %vm357_vm1, %v2900_v33  ;;  %2329 = vrcp.f32 %v610_v32  ;;  %v746_v32 = vrot.slane %v718_v10, %v2907_v37  ;;  %v886_v49 = vadd.s32 56, %v2896_v29  ;;  %v748_v55 = vcombine.high %v732_v19, %v732_v19 }
 0x236   :  { %v2314_v35 = vpop.eup %2313  ;;  %v609_v36 = vadd.f32 1.0, %v2312_v34  ;;  %vm3003_vm7 = vcmp.eq.s32.totalorder %v899_v30, 0  ;;  %v928_v56 = vsel %vm2959_vm3, %v807_v13, %v696_v40  ;;  %v668_v1 = vrot.slane %v2898_v31, 7 }
 0x237   :  { %v2909_v38 = vpop.eup %2315  ;;  %v612_v39 = vadd.f32 1.0, %v2314_v35  ;;  %v823_v54 = vrot.slane %v746_v32, %v2934_v57  ;;  %v750_v59 = vcombine.high %v746_v32, %v746_v32  ;;  %v902_v5 = vand.u32 7, %v886_v49 }
 0x238   :  { %v2318_v41 = vpop.eup %2317  ;;  %654 = vst.msk [vmem:[#allocation2 + $0x38] sm:$0xff] %vm357_vm1, %v2909_v38  ;;  %2331 = vrcp.f32 %v609_v36  ;;  %v1796_v62 = vld [vmem:[#allocation2 + $0x7] ss:$8 sm:$0xf]  ;;  %v900_v36 = vand.u32 7, %v884_v14  ;;  %v887_v8 = vadd.s32 64, %v2896_v29  ;;  %v827_v9 = vrot.slane %v748_v55, %v2934_v57 }
 0x239   :  { %2333 = vrcp.f32 %v612_v39  ;;  %v611_v42 = vadd.f32 1.0, %v2318_v41  ;;  %v758_v39 = vrot.slane %v2964_v20, %v2907_v37  ;;  %v666_v41 = vrot.slane %v2888_v23, 7 }
 0x23a   :  { %v2913_v43 = vpop.eup %2319  ;;  %vm3011_vm8 = vcmp.eq.s32.totalorder %v900_v36, 0  ;;  %v888_v10 = vadd.s32 72, %v2896_v29  ;;  %v889_v12 = vadd.s32 80, %v2896_v29  ;;  %v751_v13 = vcombine.high %v2964_v20, %v2964_v20 }
 0x23b   :  { %v2916_v45 = vpop.eup %2321  ;;  %653 = vst.msk [vmem:[#allocation2 + $0x30] sm:$0xff] %vm357_vm1, %v2913_v43  ;;  %2335 = vrcp.f32 %v611_v42  ;;  %v819_v42 = vrot.slane %v732_v19, %v2934_v57  ;;  %v766_v61 = vcombine.high %v758_v39, %v758_v39  ;;  %v669_v4 = vrot.slane %v2913_v43, 7 }
 0x23c   :  { %v2324_v46 = vpop.eup %2323  ;;  %656 = vst.msk [vmem:[#allocation2 + $0x48] sm:$0xff] %vm357_vm1, %v2916_v45  ;;  %v670_v20 = vrot.slane %v2909_v38, 7  ;;  %v903_v32 = vand.u32 7, %v887_v8  ;;  %vm3050_vm10 = vcmp.eq.s32.totalorder %v902_v5, 0  ;;  %v890_v40 = vadd.s32 88, %v2896_v29 }
 0x23d   :  { %v2326_v47 = vpop.eup %2325  ;;  %v614_v48 = vadd.f32 1.0, %v2324_v46  ;;  %v788_v18 = vrot.slane %v766_v61, %v2907_v37  ;;  %v905_v52 = vand.u32 7, %v889_v12 }
 0x23e   :  { %v2922_v50 = vpop.eup %2327  ;;  %v613_v51 = vadd.f32 1.0, %v2326_v47  ;;  %v695_v47 = vsel %vm681_vm2, %v664_v17, %v665_v21  ;;  %v774_v17 = vrot.slane %v758_v39, %v2907_v37  ;;  %v904_v39 = vand.u32 7, %v888_v10 }
 0x23f   :  { %v2924_v53 = vpop.eup %2329  ;;  %655 = vst.msk [vmem:[#allocation2 + $0x40] sm:$0xff] %vm357_vm1, %v2922_v50  ;;  %2337 = vrcp.f32 %v614_v48  ;;  %v667_v48 = vrot.slane %v2900_v33, 7  ;;  %v671_v30 = vrot.slane %v2922_v50, 7  ;;  %v690_v49 = vsel %vm681_vm2, %v669_v4, %v670_v20 }
 0x240   :  { %658 = vst.msk [vmem:[#allocation2 + $0x58] sm:$0xff] %vm357_vm1, %v2924_v53  ;;  %2339 = vrcp.f32 %v613_v51  ;;  %vm919_vm11 = vcmp.eq.s32.totalorder %v903_v32, 0  ;;  %vm3072_vm12 = vcmp.eq.s32.totalorder %v904_v39, 0  ;;  %v906_v61 = vand.u32 7, %v890_v40 }
 0x241   :  { %v693_v3 = vsel %vm681_vm2, %v666_v41, %v667_v48  ;;  %v692_v24 = vsel %vm681_vm2, %v667_v48, %v668_v1  ;;  %vm3084_vm13 = vcmp.eq.s32.totalorder %v905_v52, 0 }
 0x242   :  { %v2938_v60 = vpop.eup %2331  ;;  %v1797_v63 = vld [vmem:[#allocation2 + $0x7] ss:$8 sm:$0xf0]  ;;  %vm3095_vm14 = vcmp.eq.s32.totalorder %v906_v61, 0 }
 0x243   :  { %v2941_v0 = vpop.eup %2333  ;;  %657 = vst.msk [vmem:[#allocation2 + $0x50] sm:$0xff] %vm357_vm1, %v2938_v60  ;;  %v1798_v2 = vor.u32 %v1797_v63, %v1796_v62  ;;  %v929_v62 = vsel %vm2968_vm4, %v811_v22, %v695_v47  ;;  %v694_v63 = vsel %vm681_vm2, %v665_v21, %v666_v41  ;;  %v931_v22 = vsel %vm3003_vm7, %v819_v42, %v693_v3 }
 0x244   :  { %660 = vst.msk [vmem:[#allocation2 + $0x68] sm:$0xff] %vm357_vm1, %v2941_v0  ;;  %v930_v14 = vsel %vm2976_vm5, %v815_v25, %v694_v63  ;;  %v691_v25 = vsel %vm681_vm2, %v668_v1, %v669_v4  ;;  %v765_v41 = vrot.slane %v751_v13, %v2907_v37  ;;  %v932_v42 = vsel %vm3011_vm8, %v823_v54, %v692_v24 }
 0x245   :  { %v2947_v6 = vpop.eup %2335  ;;  %1803 = vst.msk [vmem:[#allocation13] sm:$0xff] %vm357_vm1, %v1798_v2  ;;  %v901_v2 = vand.u32 7, %v885_v44  ;;  %v835_v44 = vrot.slane %v774_v17, %v2934_v57  ;;  %v796_v47 = vcombine.high %v774_v17, %v774_v17  ;;  %v689_v54 = vsel %vm681_vm2, %v670_v20, %v671_v30 }
 0x246   :  { %659 = vst.msk [vmem:[#allocation2 + $0x60] sm:$0xff] %vm357_vm1, %v2947_v6  ;;  %v673_v55 = vrot.slane %v2938_v60, 7  ;;  %v892_v3 = vadd.s32 104, %v2896_v29  ;;  %v675_v12 = vrot.slane %v2947_v6, 7  ;;  %v894_v24 = vadd.s32 120, %v2896_v29 }
 0x247   :  { %vm3045_vm9 = vcmp.eq.s32.totalorder %v901_v2, 0  ;;  %v843_v1 = vrot.slane %v796_v47, %v2934_v57  ;;  %v781_v2 = vrot.slane %v765_v41, %v2907_v37  ;;  %v935_v4 = vsel %vm919_vm11, %v835_v44, %v689_v54 }
 0x248   :  { %v933_v48 = vsel %vm3045_vm9, %v827_v9, %v691_v25  ;;  %v674_v9 = vrot.slane %v2924_v53, 7  ;;  %v676_v25 = vrot.slane %v2941_v0, 7 }
 0x249   :  { %v2973_v27 = vpop.eup %2337  ;;  %v797_v28 = vcombine.high %v781_v2, %v781_v2 }
 0x24a   :  { %v2981_v34 = vpop.eup %2339  ;;  %662 = vst.msk [vmem:[#allocation2 + $0x78] sm:$0xff] %vm357_vm1, %v2973_v27  ;;  %v678_v35 = vrot.slane %v2973_v27, 7  ;;  %v1800_v19 = vld [vmem:[#allocation2 + $0x47] ss:$8 sm:$0xf] }
 0x24b   :  { %661 = vst.msk [vmem:[#allocation2 + $0x70] sm:$0xff] %vm357_vm1, %v2981_v34  ;;  %v859_v44 = vrot.slane %v797_v28, %v2934_v57 }
 0x24c   :  { %v697_v46 = vsel %vm681_vm2, %v678_v35, %v663_v15  ;;  %v831_v15 = vrot.slane %v750_v59, %v2934_v57  ;;  %v798_v59 = vcombine.high %v788_v18, %v788_v18 }
 0x24d   :  { %v927_v51 = vsel %vm911_vm6, %v803_v16, %v697_v46  ;;  %v839_v46 = vrot.slane %v788_v18, %v2934_v57 }
 0x24e   :  { %2139 = vmatprep.mubr.msk.f32.mxu0 %vm357_vm1, %v927_v51  ;;  %v672_v51 = vrot.slane %v2916_v45, 7  ;;  %v934_v63 = vsel %vm3050_vm10, %v831_v15, %v690_v49  ;;  %v847_v15 = vrot.slane %v798_v59, %v2934_v57  ;;  %v1262_v59 = vld [vmem:[#allocation11 + $0x18] sm:$0xff] }
 0x24f   :  { %2140 = vmatmul.mubr.msk.f32.vlgmr.msra.gmra.mrb[8].mxu0 %vm357_vm1, %v928_v56  ;;  %v891_v56 = vadd.s32 96, %v2896_v29 }
 0x250   :  { %2142 = vmatprep.mubr.msk.f32.mxu0 %vm357_vm1, %v929_v62  ;;  %v767_v62 = vcombine.high %v765_v41, %v765_v41  ;;  %v688_v5 = vsel %vm681_vm2, %v671_v30, %v672_v51  ;;  %v687_v10 = vsel %vm681_vm2, %v672_v51, %v673_v55  ;;  %v677_v30 = vrot.slane %v2981_v34, 7 }
 0x251   :  { %v907_v13 = vand.u32 7, %v891_v56  ;;  %v937_v20 = vsel %vm3084_vm13, %v843_v1, %v687_v10  ;;  %v1260_v56 = vld [vmem:[#allocation11 + $0x8] sm:$0xff]  ;;  %v1482_v1 = vld [vmem:[%s3290_s10 + $0x18] sm:$0xff] }
 0x252   :  { %v1801_v21 = vld [vmem:[#allocation2 + $0x47] ss:$8 sm:$0xf0]  ;;  %v795_v18 = vrot.slane %v767_v62, %v2907_v37  ;;  %v685_v37 = vsel %vm681_vm2, %v674_v9, %v675_v12  ;;  %v683_v47 = vsel %vm681_vm2, %v676_v25, %v677_v30  ;;  %v682_v52 = vsel %vm681_vm2, %v677_v30, %v678_v35 }
 0x253   :  { %2143 = vmatmul.mubr.msk.f32.gmra.mrb[10].mxu0 %vm357_vm1, %v930_v14  ;;  %v1802_v16 = vor.u32 %v1801_v21, %v1800_v19  ;;  %v893_v14 = vadd.s32 112, %v2896_v29  ;;  %v936_v19 = vsel %vm3072_vm12, %v839_v46, %v688_v5  ;;  %v851_v21 = vrot.slane %v781_v2, %v2934_v57  ;;  %v1479_v29 = vld [vmem:[%s3290_s10] sm:$0xff]  ;;  %v1480_v35 = vld [vmem:[%s3290_s10 + $0x8] sm:$0xff]  ;;  %v1481_v62 = vld [vmem:[%s3290_s10 + $0x10] sm:$0xff] }
 0x254   :  { %2145 = vmatprep.mubr.msk.f32.mxu0 %vm357_vm1, %v931_v22  ;;  %v908_v22 = vand.u32 7, %v892_v3  ;;  %vm923_vm15 = vcmp.eq.s32.totalorder %v907_v13, 0  ;;  %v855_v39 = vrot.slane %v795_v18, %v2934_v57  ;;  %v799_v40 = vcombine.high %v795_v18, %v795_v18 }
 0x255   :  { %1804 = vst.msk [vmem:[#allocation13 + $0x8] sm:$0xff] %vm357_vm1, %v1802_v16  ;;  %v686_v16 = vsel %vm681_vm2, %v673_v55, %v674_v9  ;;  %v909_v32 = vand.u32 7, %v893_v14  ;;  %v939_v41 = vsel %vm923_vm15, %v851_v21, %v685_v37  ;;  %v910_v46 = vand.u32 7, %v894_v24  ;;  %v1259_v55 = vld [vmem:[#allocation11] sm:$0xff] }
 0x256   :  { %v938_v36 = vsel %vm3095_vm14, %v847_v15, %v686_v16  ;;  %vm924_vm3 = vcmp.eq.s32.totalorder %v908_v22, 0  ;;  %v863_v49 = vrot.slane %v799_v40, %v2934_v57  ;;  %v2247_v58 = vpack.c.bf16 %v1260_v56, %v1259_v55  ;;  %v1261_v57 = vld [vmem:[#allocation11 + $0x10] sm:$0xff] }
 0x257   :  { %2146 = vmatmul.mubr.msk.f32.gmra.mrb[12].mxu0 %vm357_vm1, %v932_v42  ;;  %v684_v42 = vsel %vm681_vm2, %v675_v12, %v676_v25  ;;  %vm925_vm4 = vcmp.eq.s32.totalorder %v909_v32, 0  ;;  %vm926_vm5 = vcmp.eq.s32.totalorder %v910_v46, 0  ;;  %v2251_v61 = vpack.c.bf16 %v1262_v59, %v1261_v57 }
 0x258   :  { %2148 = vmatprep.mubr.msk.f32.mxu0 %vm357_vm1, %v933_v48  ;;  %v940_v48 = vsel %vm924_vm3, %v855_v39, %v684_v42  ;;  %v941_v51 = vsel %vm925_vm4, %v859_v44, %v683_v47  ;;  %v942_v54 = vsel %vm926_vm5, %v863_v49, %v682_v52  ;;  %2248 = vmatprep.subr.bf16.mxu1 %v2247_v58 }
 0x259   :  { %2250 = vmatpush3.bf16.msra.mxu1 %v2247_v58  ;;  %v2259_v2 = vpack.c.bf16 %v1482_v1, %v1481_v62 }
 0x25a   :  { %2252 = vmatprep.subr.bf16.mxu1 %v2251_v61 }
 0x25b   :  { %2149 = vmatmul.mubr.msk.f32.gmra.mrb[14].mxu0 %vm357_vm1, %v934_v63  ;;  %v2255_v63 = vpack.c.bf16 %v1480_v35, %v1479_v29 }
 0x25c   :  { %2151 = vmatprep.mubr.msk.f32.mxu0 %vm357_vm1, %v935_v4  ;;  %v3144_v4 = vld [vmem:[#allocation9] ss:$0 sm:$0xff] }
 0x25d   :  { %2254 = vmatpush3.bf16.msra.mxu1 %v2251_v61  ;;  %2256 = vmatprep.subr.bf16.mxu0 %v2255_v63 }
 0x25e   :  { %2258 = vmatpush3.bf16.msra.mxu0 %v2255_v63 }
 0x25f   :  { %2152 = vmatmul.mubr.msk.f32.gmra.mrb[16].mxu0 %vm357_vm1, %v936_v19  ;;  %2260 = vmatprep.subr.bf16.mxu0 %v2259_v2 }
 0x260   :  { %2154 = vmatprep.mubr.msk.f32.mxu0 %vm357_vm1, %v937_v20 }
 0x262   :  { %2262 = vmatpush3.bf16.msra.mxu0 %v2259_v2 }
 0x263   :  { %2155 = vmatmul.mubr.msk.f32.gmra.mrb[18].mxu0 %vm357_vm1, %v938_v36 }
 0x264   :  { %2157 = vmatprep.mubr.msk.f32.mxu0 %vm357_vm1, %v939_v41 }
 0x267   :  { %2158 = vmatmul.mubr.msk.f32.gmra.mrb[20].mxu0 %vm357_vm1, %v940_v48 }
 0x268   :  { %2160 = vmatprep.mubr.msk.f32.mxu0 %vm357_vm1, %v941_v51 }
 0x26b   :  { %2161 = vmatmul.mubr.msk.f32.gmra.mrb[22].mxu0 %vm357_vm1, %v942_v54 }
 0x322   :  { %v2141_v3 = vpop.f32.mrb[8].mxu0 }
 0x323   :  { %v1067_v5 = vadd.f32 %v2878_v7, %v2141_v3  ;;  %v1061_v8 = vpop.f32.mrb[9].mxu0 }
 0x324   :  { %v1062_v9 = vadd.f32 %v2880_v11, %v1061_v8 }
 0x325   :  { %v1148_v10 = vadd.f32 %v3144_v4, %v1067_v5 }
 0x326   :  { %v1147_v12 = vadd.f32 %v3144_v4, %v1062_v9  ;;  %v2144_v13 = vpop.f32.mrb[10].mxu0 }
 0x327   :  { %v1908_v14 = vmul.f32 -1.442695, %v1148_v10  ;;  %v1077_v15 = vadd.f32 %v2888_v23, %v2144_v13  ;;  %v1071_v17 = vpop.f32.mrb[11].mxu0 }
 0x328   :  { %v1907_v18 = vmul.f32 -1.442695, %v1147_v12  ;;  %v1072_v19 = vadd.f32 %v2890_v26, %v1071_v17 }
 0x329   :  { %2341 = vpow2.f32 %v1908_v14  ;;  %v1150_v21 = vadd.f32 %v3144_v4, %v1077_v15 }
 0x32a   :  { %2343 = vpow2.f32 %v1907_v18  ;;  %v1149_v7 = vadd.f32 %v3144_v4, %v1072_v19  ;;  %v2147_v22 = vpop.f32.mrb[12].mxu0 }
 0x32b   :  { %v1910_v11 = vmul.f32 -1.442695, %v1150_v21  ;;  %v1087_v24 = vadd.f32 %v2898_v31, %v2147_v22  ;;  %v1081_v20 = vpop.f32.mrb[13].mxu0 }
 0x32c   :  { %v1909_v16 = vmul.f32 -1.442695, %v1149_v7  ;;  %v1082_v25 = vadd.f32 %v2900_v33, %v1081_v20 }
 0x32d   :  { %2345 = vpow2.f32 %v1910_v11  ;;  %v1152_v23 = vadd.f32 %v3144_v4, %v1087_v24 }
 0x32e   :  { %2347 = vpow2.f32 %v1909_v16  ;;  %v1151_v26 = vadd.f32 %v3144_v4, %v1082_v25  ;;  %v2150_v28 = vpop.f32.mrb[14].mxu0 }
 0x32f   :  { %v1912_v37 = vmul.f32 -1.442695, %v1152_v23  ;;  %v1097_v30 = vadd.f32 %v2909_v38, %v2150_v28  ;;  %v1091_v32 = vpop.f32.mrb[15].mxu0 }
 0x330   :  { %v1911_v36 = vmul.f32 -1.442695, %v1151_v26  ;;  %v1092_v39 = vadd.f32 %v2913_v43, %v1091_v32 }
 0x331   :  { %2349 = vpow2.f32 %v1912_v37  ;;  %v1154_v31 = vadd.f32 %v3144_v4, %v1097_v30 }
 0x332   :  { %2351 = vpow2.f32 %v1911_v36  ;;  %v1153_v33 = vadd.f32 %v3144_v4, %v1092_v39  ;;  %v2153_v40 = vpop.f32.mrb[16].mxu0 }
 0x333   :  { %v2342_v41 = vpop.eup %2341  ;;  %v1914_v42 = vmul.f32 -1.442695, %v1154_v31  ;;  %v1107_v44 = vadd.f32 %v2916_v45, %v2153_v40  ;;  %v1101_v46 = vpop.f32.mrb[17].mxu0 }
 0x334   :  { %v2344_v47 = vpop.eup %2343  ;;  %v1212_v48 = vadd.f32 1.0, %v2342_v41  ;;  %v1913_v49 = vmul.f32 -1.442695, %v1153_v33  ;;  %v1102_v38 = vadd.f32 %v2922_v50, %v1101_v46 }
 0x335   :  { %v1211_v51 = vadd.f32 1.0, %v2344_v47  ;;  %2353 = vpow2.f32 %v1914_v42  ;;  %v1156_v43 = vadd.f32 %v3144_v4, %v1107_v44 }
 0x336   :  { %2355 = vrcp.f32 %v1212_v48  ;;  %v1155_v52 = vadd.f32 %v3144_v4, %v1102_v38  ;;  %v2156_v54 = vpop.f32.mrb[18].mxu0 }
 0x337   :  { %v2346_v55 = vpop.eup %2345  ;;  %2357 = vrcp.f32 %v1211_v51  ;;  %v1916_v56 = vmul.f32 -1.442695, %v1156_v43  ;;  %v1117_v58 = vadd.f32 %v2924_v53, %v2156_v54  ;;  %v1111_v45 = vpop.f32.mrb[19].mxu0 }
 0x338   :  { %v2348_v57 = vpop.eup %2347  ;;  %v1214_v59 = vadd.f32 1.0, %v2346_v55  ;;  %2359 = vpow2.f32 %v1913_v49  ;;  %v1915_v61 = vmul.f32 -1.442695, %v1155_v52  ;;  %v1112_v50 = vadd.f32 %v2938_v60, %v1111_v45 }
 0x339   :  { %v1213_v29 = vadd.f32 1.0, %v2348_v57  ;;  %2361 = vpow2.f32 %v1916_v56  ;;  %v1158_v35 = vadd.f32 %v3144_v4, %v1117_v58 }
 0x33a   :  { %2363 = vrcp.f32 %v1214_v59  ;;  %v1157_v62 = vadd.f32 %v3144_v4, %v1112_v50  ;;  %v2159_v63 = vpop.f32.mrb[20].mxu0  ;;  %v1923_v59 = vld [vmem:[%s3289_s9] ss:$0 sm:$0xff]  ;;  %s2641_s9 = smov [#allocation13]  }
 0x33b   :  { %v2350_v1 = vpop.eup %2349  ;;  %2365 = vrcp.f32 %v1213_v29  ;;  %v1918_v2 = vmul.f32 -1.442695, %v1158_v35  ;;  %v1127_v53 = vadd.f32 %v2941_v0, %v2159_v63  ;;  %v1121_v3 = vpop.f32.mrb[21].mxu0  ;;  %s1822_s27 = sshll.u32 %s2641_s9, 4  ;;  %s1823_s27 = int_to_ptr.vmem [resolvable:$true] %s1822_s27 }
 0x33c   :  { %v2352_v5 = vpop.eup %2351  ;;  %v1216_v8 = vadd.f32 1.0, %v2350_v1  ;;  %2367 = vpow2.f32 %v1915_v61  ;;  %v1917_v9 = vmul.f32 -1.442695, %v1157_v62  ;;  %v1122_v60 = vadd.f32 %v2947_v6, %v1121_v3  ;;  %s2579_s0 = scalar_lea.vmem %s1823_s27, 256  ;;  %p2584_p13 = scmp.lt.s32.totalorder %s1823_s27, %s1823_s27 }
 0x33d   :  { %v1215_v10 = vadd.f32 1.0, %v2352_v5  ;;  %2369 = vpow2.f32 %v1918_v2  ;;  %v1160_v12 = vadd.f32 %v3144_v4, %v1127_v53  ;;  %p2580_p12 = scmp.ne.s32.totalorder %s1823_s27, %s2579_s0  ;;  %p2585_p0 = scmp.lt.s32.totalorder %s2579_s0, %s2579_s0 }
 0x33e   :  { %2371 = vrcp.f32 %v1216_v8  ;;  %v1159_v13 = vadd.f32 %v3144_v4, %v1122_v60  ;;  %v2162_v14 = vpop.f32.mrb[22].mxu0 }
 0x33f   :  { %v2354_v15 = vpop.eup %2353  ;;  %2373 = vrcp.f32 %v1215_v10  ;;  %v1920_v17 = vmul.f32 -1.442695, %v1160_v12  ;;  %v1137_v0 = vadd.f32 %v2973_v27, %v2162_v14  ;;  %v1131_v18 = vpop.f32.mrb[23].mxu0  ;;  %p2586_p1 = por %p2585_p0, %p2584_p13 }
 0x340   :  { %v2356_v19 = vpop.eup %2355  ;;  %2375 = vpow2.f32 %v1917_v9  ;;  %v1919_v21 = vmul.f32 -1.442695, %v1159_v13  ;;  %v1132_v7 = vadd.f32 %v2981_v34, %v1131_v18  ;;  %v1218_v24 = vadd.f32 1.0, %v2354_v15 }
 0x341   :  { %v2358_v6 = vpop.eup %2357  ;;  %2377 = vpow2.f32 %v1920_v17  ;;  %v1162_v22 = vadd.f32 %v3144_v4, %v1137_v0  ;;  %p2587_p2 = pnand %p2586_p1, %p2580_p12 }
 0x342   :  { %v2360_v11 = vpop.eup %2359  ;;  %v1161_v20 = vadd.f32 %v3144_v4, %v1132_v7  ;;  %2171 = vmatprep.mubr.msk.f32.mxu1 %vm357_vm1, %v2358_v6  ;;  %2379 = vpow2.f32 %v1919_v21 }
 0x343   :  { %v2362_v16 = vpop.eup %2361  ;;  %v1217_v25 = vadd.f32 1.0, %v2360_v11  ;;  %v1922_v27 = vmul.f32 -1.442695, %v1162_v22  ;;  %2172 = vmatmul.mubr.msk.f32.vlgmr.msra.gmra.mrb[24].mxu1 %vm357_vm1, %v2356_v19 }
 0x344   :  { %v2364_v23 = vpop.eup %2363  ;;  %v1921_v26 = vmul.f32 -1.442695, %v1161_v20  ;;  %v1220_v37 = vadd.f32 1.0, %v2362_v16 }
 0x345   :  { %v2366_v28 = vpop.eup %2365  ;;  %2381 = vrcp.f32 %v1217_v25 }
 0x346   :  { %v2368_v34 = vpop.eup %2367  ;;  %2383 = vrcp.f32 %v1218_v24  ;;  %2174 = vmatprep.mubr.msk.f32.mxu1 %vm357_vm1, %v2366_v28 }
 0x347   :  { %v2370_v30 = vpop.eup %2369  ;;  %v1219_v32 = vadd.f32 1.0, %v2368_v34  ;;  %2385 = vpow2.f32 %v1922_v27  ;;  %2175 = vmatmul.mubr.msk.f32.gmra.mrb[26].mxu1 %vm357_vm1, %v2364_v23 }
 0x348   :  { %v2372_v4 = vpop.eup %2371  ;;  %2387 = vpow2.f32 %v1921_v26  ;;  %v1222_v31 = vadd.f32 1.0, %v2370_v30 }
 0x349   :  { %v2374_v36 = vpop.eup %2373  ;;  %2389 = vrcp.f32 %v1219_v32 }
 0x34a   :  { %v2376_v39 = vpop.eup %2375  ;;  %2391 = vrcp.f32 %v1220_v37  ;;  %2177 = vmatprep.mubr.msk.f32.mxu1 %vm357_vm1, %v2374_v36 }
 0x34b   :  { %v2378_v33 = vpop.eup %2377  ;;  %v1221_v40 = vadd.f32 1.0, %v2376_v39  ;;  %2178 = vmatmul.mubr.msk.f32.gmra.mrb[28].mxu1 %vm357_vm1, %v2372_v4 }
 0x34c   :  { %v2380_v41 = vpop.eup %2379  ;;  %v1224_v42 = vadd.f32 1.0, %v2378_v33 }
 0x34d   :  { %2393 = vrcp.f32 %v1221_v40  ;;  %v1223_v44 = vadd.f32 1.0, %v2380_v41 }
 0x34e   :  { %2395 = vrcp.f32 %v1222_v31 }
 0x34f   :  { %v2382_v46 = vpop.eup %2381  ;;  %2397 = vrcp.f32 %v1223_v44 }
 0x350   :  { %v2384_v47 = vpop.eup %2383  ;;  %2180 = vmatprep.mubr.msk.f32.mxu1 %vm357_vm1, %v2382_v46  ;;  %2399 = vrcp.f32 %v1224_v42 }
 0x351   :  { %v2386_v48 = vpop.eup %2385  ;;  %2181 = vmatmul.mubr.msk.f32.gmra.mrb[30].mxu1 %vm357_vm1, %v2384_v47 }
 0x352   :  { %v2388_v49 = vpop.eup %2387  ;;  %v1226_v38 = vadd.f32 1.0, %v2386_v48 }
 0x353   :  { %v2390_v51 = vpop.eup %2389  ;;  %v1225_v43 = vadd.f32 1.0, %v2388_v49 }
 0x354   :  { %v2392_v52 = vpop.eup %2391  ;;  %2183 = vmatprep.mubr.msk.f32.mxu1 %vm357_vm1, %v2390_v51 }
 0x355   :  { %2401 = vrcp.f32 %v1225_v43  ;;  %2184 = vmatmul.mubr.msk.f32.gmra.mrb[32].mxu1 %vm357_vm1, %v2392_v52 }
 0x356   :  { %2403 = vrcp.f32 %v1226_v38 }
 0x357   :  { %v2394_v54 = vpop.eup %2393 }
 0x358   :  { %v2396_v55 = vpop.eup %2395  ;;  %2186 = vmatprep.mubr.msk.f32.mxu1 %vm357_vm1, %v2394_v54 }
 0x359   :  { %2187 = vmatmul.mubr.msk.f32.gmra.mrb[34].mxu1 %vm357_vm1, %v2396_v55  ;;  %v2398_v56 = vpop.eup %2397 }
 0x35a   :  { %2189 = vmatprep.mubr.msk.f32.mxu1 %vm357_vm1, %v2398_v56  ;;  %v2400_v58 = vpop.eup %2399 }
 0x35d   :  { %2190 = vmatmul.mubr.msk.f32.gmra.mrb[36].mxu1 %vm357_vm1, %v2400_v58 }
 0x35f   :  { %v2402_v45 = vpop.eup %2401 }
 0x360   :  { %v2404_v57 = vpop.eup %2403  ;;  %2192 = vmatprep.mubr.msk.f32.mxu1 %vm357_vm1, %v2402_v45 }
 0x361   :  { %2193 = vmatmul.mubr.msk.f32.gmra.mrb[38].mxu1 %vm357_vm1, %v2404_v57 }
 0x416   :  { %v2173_v61 = vpop.f32.mrb[24].mxu1 }
 0x417   :  { %v1390_v50 = vadd.f32 %v2173_v61, %v1923_v59  ;;  %v1384_v29 = vpop.f32.mrb[25].mxu1 }
 0x418   :  { %v1385_v35 = vadd.f32 %v1923_v59, %v1384_v29 }
 0x419   :  { %v1464_v1 = vmax.f32 %v1390_v50, 0.0 }
 0x41a   :  { %v1463_v62 = vmax.f32 %v1385_v35, 0.0  ;;  %v2176_v63 = vpop.f32.mrb[26].mxu1 }
 0x41b   :  { %v1400_v2 = vadd.f32 %v2176_v63, %v1923_v59  ;;  %v1394_v53 = vpop.f32.mrb[27].mxu1 }
 0x41c   :  { %v1395_v3 = vadd.f32 %v1923_v59, %v1394_v53  ;;  %2203 = vmatprep.mubr.msk.f32.mxu0 %vm357_vm1, %v1463_v62 }
 0x41d   :  { %2204 = vmatmul.mubr.msk.f32.vlgmr.msra.gmra.mrb[24].mxu0 %vm357_vm1, %v1464_v1  ;;  %v1466_v9 = vmax.f32 %v1400_v2, 0.0 }
 0x41e   :  { %v1465_v5 = vmax.f32 %v1395_v3, 0.0  ;;  %v2179_v8 = vpop.f32.mrb[28].mxu1 }
 0x41f   :  { %v1410_v60 = vadd.f32 %v2179_v8, %v1923_v59  ;;  %v1404_v10 = vpop.f32.mrb[29].mxu1 }
 0x420   :  { %v1405_v12 = vadd.f32 %v1923_v59, %v1404_v10  ;;  %2206 = vmatprep.mubr.msk.f32.mxu0 %vm357_vm1, %v1465_v5 }
 0x421   :  { %2207 = vmatmul.mubr.msk.f32.gmra.mrb[26].mxu0 %vm357_vm1, %v1466_v9  ;;  %v1468_v14 = vmax.f32 %v1410_v60, 0.0 }
 0x422   :  { %v1467_v13 = vmax.f32 %v1405_v12, 0.0 }
 0x424   :  { %v2182_v15 = vpop.f32.mrb[30].mxu1  ;;  %2209 = vmatprep.mubr.msk.f32.mxu0 %vm357_vm1, %v1467_v13 }
 0x425   :  { %v1420_v17 = vadd.f32 %v2182_v15, %v1923_v59  ;;  %v1414_v0 = vpop.f32.mrb[31].mxu1  ;;  %2210 = vmatmul.mubr.msk.f32.gmra.mrb[28].mxu0 %vm357_vm1, %v1468_v14 }
 0x426   :  { %v1415_v18 = vadd.f32 %v1923_v59, %v1414_v0 }
 0x427   :  { %v1470_v7 = vmax.f32 %v1420_v17, 0.0 }
 0x428   :  { %v1469_v19 = vmax.f32 %v1415_v18, 0.0  ;;  %v2185_v21 = vpop.f32.mrb[32].mxu1 }
 0x429   :  { %v1430_v6 = vadd.f32 %v2185_v21, %v1923_v59  ;;  %v1424_v22 = vpop.f32.mrb[33].mxu1 }
 0x42a   :  { %v1425_v11 = vadd.f32 %v1923_v59, %v1424_v22  ;;  %2212 = vmatprep.mubr.msk.f32.mxu0 %vm357_vm1, %v1469_v19 }
 0x42b   :  { %2213 = vmatmul.mubr.msk.f32.gmra.mrb[30].mxu0 %vm357_vm1, %v1470_v7  ;;  %v1472_v16 = vmax.f32 %v1430_v6, 0.0 }
 0x42c   :  { %v1471_v24 = vmax.f32 %v1425_v11, 0.0  ;;  %v2188_v20 = vpop.f32.mrb[34].mxu1 }
 0x42d   :  { %v1440_v25 = vadd.f32 %v2188_v20, %v1923_v59  ;;  %v1434_v27 = vpop.f32.mrb[35].mxu1 }
 0x42e   :  { %v1435_v23 = vadd.f32 %v1923_v59, %v1434_v27  ;;  %2215 = vmatprep.mubr.msk.f32.mxu0 %vm357_vm1, %v1471_v24 }
 0x42f   :  { %2216 = vmatmul.mubr.msk.f32.gmra.mrb[32].mxu0 %vm357_vm1, %v1472_v16  ;;  %v1474_v34 = vmax.f32 %v1440_v25, 0.0 }
 0x430   :  { %v1473_v26 = vmax.f32 %v1435_v23, 0.0  ;;  %v2191_v28 = vpop.f32.mrb[36].mxu1 }
 0x431   :  { %v1450_v37 = vadd.f32 %v2191_v28, %v1923_v59  ;;  %v1444_v30 = vpop.f32.mrb[37].mxu1 }
 0x432   :  { %v1445_v32 = vadd.f32 %v1923_v59, %v1444_v30  ;;  %2218 = vmatprep.mubr.msk.f32.mxu0 %vm357_vm1, %v1473_v26 }
 0x433   :  { %2219 = vmatmul.mubr.msk.f32.gmra.mrb[34].mxu0 %vm357_vm1, %v1474_v34  ;;  %v1476_v39 = vmax.f32 %v1450_v37, 0.0 }
 0x434   :  { %v1475_v4 = vmax.f32 %v1445_v32, 0.0  ;;  %v2194_v36 = vpop.f32.mrb[38].mxu1 }
 0x435   :  { %v1460_v31 = vadd.f32 %v2194_v36, %v1923_v59  ;;  %v1454_v33 = vpop.f32.mrb[39].mxu1 }
 0x436   :  { %v1455_v40 = vadd.f32 %v1923_v59, %v1454_v33  ;;  %2221 = vmatprep.mubr.msk.f32.mxu0 %vm357_vm1, %v1475_v4 }
 0x437   :  { %2222 = vmatmul.mubr.msk.f32.gmra.mrb[36].mxu0 %vm357_vm1, %v1476_v39  ;;  %v1478_v42 = vmax.f32 %v1460_v31, 0.0 }
 0x438   :  { %v1477_v41 = vmax.f32 %v1455_v40, 0.0 }
 0x43a   :  { %2224 = vmatprep.mubr.msk.f32.mxu0 %vm357_vm1, %v1477_v41 }
 0x43b   :  { %2225 = vmatmul.mubr.msk.f32.gmra.mrb[38].mxu0 %vm357_vm1, %v1478_v42 }
 0x43c   :  { %2590 = shalt.err (!%p2587_p2)
}
 0x43d   :  { %s2591_s29 = scalar_lea.hbm %s3293_s13, 256 }
 0x43e   :  { %p2592_p3 = scmp.ne.s32.totalorder %s3293_s13, %s2591_s29  ;;  %p2595_p4 = scmp.lt.u32.totalorder %s2591_s29, %s3293_s13 }
 0x440   :  { %p2597_p5 = pnand %p2595_p4, %p2592_p3 }
 0x442   :  { %2600 = shalt.err (!%p2597_p5)
}
 0x443   :  { %1828 = dma.vmem_to_hbm [thread:$0]  %s1823_s27, 256, %s3293_s13, [#allocation14], %s2635_s20, %s2635_s20, %s2636_s21  }
 0x444   :  { %v3231_v44 = vld [vmem:[%s3291_s11] ss:$0 sm:$0xff]  ;;  %s2642_s11 = smov [#allocation12]  }
 0x445   :  { %s1810_s13 = sshll.u32 %s2642_s11, 4  ;;  %s1811_s13 = int_to_ptr.vmem [resolvable:$true] %s1810_s13 }
 0x446   :  { %s2601_s26 = scalar_lea.vmem %s1811_s13, 2048  ;;  %p2606_p7 = scmp.lt.s32.totalorder %s1811_s13, %s1811_s13 }
 0x447   :  { %p2602_p6 = scmp.ne.s32.totalorder %s1811_s13, %s2601_s26  ;;  %p2607_p8 = scmp.lt.s32.totalorder %s2601_s26, %s2601_s26 }
 0x449   :  { %p2608_p9 = por %p2607_p8, %p2606_p7 }
 0x44b   :  { %p2609_p10 = pnand %p2608_p9, %p2602_p6 }
 0x4f0   :  { %v2205_v46 = vpop.f32.mrb[24].mxu0 }
 0x4f1   :  { %v1610_v47 = vadd.f32 %v2205_v46, %v3231_v44  ;;  %v1604_v48 = vpop.f32.mrb[25].mxu0 }
 0x4f2   :  { %v1605_v49 = vadd.f32 %v3231_v44, %v1604_v48 }
 0x4f3   :  { %v1958_v38 = vmul.f32 -1.442695, %v1610_v47 }
 0x4f4   :  { %v1957_v51 = vmul.f32 -1.442695, %v1605_v49  ;;  %v2208_v43 = vpop.f32.mrb[26].mxu0 }
 0x4f5   :  { %2405 = vpow2.f32 %v1958_v38  ;;  %v1620_v52 = vadd.f32 %v2208_v43, %v3231_v44  ;;  %v1614_v54 = vpop.f32.mrb[27].mxu0 }
 0x4f6   :  { %2407 = vpow2.f32 %v1957_v51  ;;  %v1615_v55 = vadd.f32 %v3231_v44, %v1614_v54 }
 0x4f7   :  { %v1960_v56 = vmul.f32 -1.442695, %v1620_v52 }
 0x4f8   :  { %v1959_v58 = vmul.f32 -1.442695, %v1615_v55  ;;  %v2211_v45 = vpop.f32.mrb[28].mxu0 }
 0x4f9   :  { %2409 = vpow2.f32 %v1960_v56  ;;  %v1630_v57 = vadd.f32 %v2211_v45, %v3231_v44  ;;  %v1624_v59 = vpop.f32.mrb[29].mxu0 }
 0x4fa   :  { %2411 = vpow2.f32 %v1959_v58  ;;  %v1625_v61 = vadd.f32 %v3231_v44, %v1624_v59 }
 0x4fb   :  { %v1962_v50 = vmul.f32 -1.442695, %v1630_v57 }
 0x4fc   :  { %v1961_v29 = vmul.f32 -1.442695, %v1625_v61 }
 0x4fd   :  { %2413 = vpow2.f32 %v1962_v50 }
 0x4fe   :  { %2415 = vpow2.f32 %v1961_v29  ;;  %v2214_v35 = vpop.f32.mrb[30].mxu0 }
 0x4ff   :  { %v2406_v62 = vpop.eup %2405  ;;  %v1640_v63 = vadd.f32 %v2214_v35, %v3231_v44  ;;  %v1634_v1 = vpop.f32.mrb[31].mxu0 }
 0x500   :  { %v2408_v2 = vpop.eup %2407  ;;  %v1732_v53 = vadd.f32 1.0, %v2406_v62  ;;  %v1635_v3 = vadd.f32 %v3231_v44, %v1634_v1 }
 0x501   :  { %v1731_v5 = vadd.f32 1.0, %v2408_v2  ;;  %v1964_v8 = vmul.f32 -1.442695, %v1640_v63 }
 0x502   :  { %2417 = vrcp.f32 %v1732_v53  ;;  %v1963_v9 = vmul.f32 -1.442695, %v1635_v3  ;;  %v2217_v60 = vpop.f32.mrb[32].mxu0 }
 0x503   :  { %v2410_v10 = vpop.eup %2409  ;;  %2419 = vrcp.f32 %v1731_v5  ;;  %v1650_v12 = vadd.f32 %v2217_v60, %v3231_v44  ;;  %v1644_v13 = vpop.f32.mrb[33].mxu0 }
 0x504   :  { %v2412_v14 = vpop.eup %2411  ;;  %v1734_v15 = vadd.f32 1.0, %v2410_v10  ;;  %2421 = vpow2.f32 %v1964_v8  ;;  %v1645_v17 = vadd.f32 %v3231_v44, %v1644_v13 }
 0x505   :  { %v1733_v0 = vadd.f32 1.0, %v2412_v14  ;;  %2423 = vpow2.f32 %v1963_v9  ;;  %v1966_v18 = vmul.f32 -1.442695, %v1650_v12 }
 0x506   :  { %2425 = vrcp.f32 %v1734_v15  ;;  %v1965_v19 = vmul.f32 -1.442695, %v1645_v17  ;;  %v2220_v21 = vpop.f32.mrb[34].mxu0 }
 0x507   :  { %v2414_v7 = vpop.eup %2413  ;;  %2427 = vrcp.f32 %v1733_v0  ;;  %v1660_v6 = vadd.f32 %v2220_v21, %v3231_v44  ;;  %v1654_v22 = vpop.f32.mrb[35].mxu0 }
 0x508   :  { %v2416_v11 = vpop.eup %2415  ;;  %v1736_v24 = vadd.f32 1.0, %v2414_v7  ;;  %2429 = vpow2.f32 %v1966_v18  ;;  %v1655_v20 = vadd.f32 %v3231_v44, %v1654_v22 }
 0x509   :  { %v1735_v16 = vadd.f32 1.0, %v2416_v11  ;;  %2431 = vpow2.f32 %v1965_v19  ;;  %v1968_v25 = vmul.f32 -1.442695, %v1660_v6 }
 0x50a   :  { %2433 = vrcp.f32 %v1736_v24  ;;  %v1967_v27 = vmul.f32 -1.442695, %v1655_v20  ;;  %v2223_v23 = vpop.f32.mrb[36].mxu0 }
 0x50b   :  { %2435 = vrcp.f32 %v1735_v16  ;;  %v1670_v26 = vadd.f32 %v2223_v23, %v3231_v44  ;;  %v1664_v28 = vpop.f32.mrb[37].mxu0 }
 0x50c   :  { %v2418_v34 = vpop.eup %2417  ;;  %2437 = vpow2.f32 %v1968_v25  ;;  %v1665_v37 = vadd.f32 %v3231_v44, %v1664_v28 }
 0x50d   :  { %v2420_v30 = vpop.eup %2419  ;;  %1780 = vst.msk [vmem:[#allocation12 + $0x8] sm:$0xff] %vm136_vm0, %v2418_v34  ;;  %2439 = vpow2.f32 %v1967_v27  ;;  %v1970_v32 = vmul.f32 -1.442695, %v1670_v26 }
 0x50e   :  { %v2422_v4 = vpop.eup %2421  ;;  %1779 = vst.msk [vmem:[#allocation12] sm:$0xff] %vm136_vm0, %v2420_v30  ;;  %v1969_v36 = vmul.f32 -1.442695, %v1665_v37  ;;  %v2226_v39 = vpop.f32.mrb[38].mxu0 }
 0x50f   :  { %v2424_v31 = vpop.eup %2423  ;;  %v1738_v33 = vadd.f32 1.0, %v2422_v4  ;;  %2441 = vpow2.f32 %v1970_v32  ;;  %v1680_v40 = vadd.f32 %v2226_v39, %v3231_v44  ;;  %v1674_v41 = vpop.f32.mrb[39].mxu0 }
 0x510   :  { %v2426_v42 = vpop.eup %2425  ;;  %v1737_v46 = vadd.f32 1.0, %v2424_v31  ;;  %2443 = vpow2.f32 %v1969_v36  ;;  %v1675_v47 = vadd.f32 %v3231_v44, %v1674_v41 }
 0x511   :  { %v2428_v48 = vpop.eup %2427  ;;  %1782 = vst.msk [vmem:[#allocation12 + $0x18] sm:$0xff] %vm136_vm0, %v2426_v42  ;;  %2445 = vrcp.f32 %v1738_v33  ;;  %v1972_v49 = vmul.f32 -1.442695, %v1680_v40 }
 0x512   :  { %v2430_v38 = vpop.eup %2429  ;;  %1781 = vst.msk [vmem:[#allocation12 + $0x10] sm:$0xff] %vm136_vm0, %v2428_v48  ;;  %2447 = vrcp.f32 %v1737_v46  ;;  %v1971_v51 = vmul.f32 -1.442695, %v1675_v47 }
 0x513   :  { %v2432_v43 = vpop.eup %2431  ;;  %v1740_v52 = vadd.f32 1.0, %v2430_v38  ;;  %2449 = vpow2.f32 %v1972_v49 }
 0x514   :  { %v2434_v54 = vpop.eup %2433  ;;  %v1739_v55 = vadd.f32 1.0, %v2432_v43  ;;  %2451 = vpow2.f32 %v1971_v51 }
 0x515   :  { %v2436_v56 = vpop.eup %2435  ;;  %1784 = vst.msk [vmem:[#allocation12 + $0x28] sm:$0xff] %vm136_vm0, %v2434_v54  ;;  %2453 = vrcp.f32 %v1740_v52 }
 0x516   :  { %v2438_v44 = vpop.eup %2437  ;;  %1783 = vst.msk [vmem:[#allocation12 + $0x20] sm:$0xff] %vm136_vm0, %v2436_v56  ;;  %2455 = vrcp.f32 %v1739_v55 }
 0x517   :  { %v2440_v58 = vpop.eup %2439  ;;  %v1742_v45 = vadd.f32 1.0, %v2438_v44 }
 0x518   :  { %v1741_v57 = vadd.f32 1.0, %v2440_v58 }
 0x519   :  { %v2442_v59 = vpop.eup %2441  ;;  %2457 = vrcp.f32 %v1742_v45 }
 0x51a   :  { %v2444_v61 = vpop.eup %2443  ;;  %2459 = vrcp.f32 %v1741_v57  ;;  %v1744_v50 = vadd.f32 1.0, %v2442_v59 }
 0x51b   :  { %v2446_v29 = vpop.eup %2445  ;;  %v1743_v35 = vadd.f32 1.0, %v2444_v61 }
 0x51c   :  { %v2448_v62 = vpop.eup %2447  ;;  %1786 = vst.msk [vmem:[#allocation12 + $0x38] sm:$0xff] %vm136_vm0, %v2446_v29  ;;  %2461 = vrcp.f32 %v1744_v50 }
 0x51d   :  { %v2450_v63 = vpop.eup %2449  ;;  %1785 = vst.msk [vmem:[#allocation12 + $0x30] sm:$0xff] %vm136_vm0, %v2448_v62  ;;  %2463 = vrcp.f32 %v1743_v35 }
 0x51e   :  { %v2452_v1 = vpop.eup %2451  ;;  %v1746_v2 = vadd.f32 1.0, %v2450_v63 }
 0x51f   :  { %v2454_v53 = vpop.eup %2453  ;;  %v1745_v3 = vadd.f32 1.0, %v2452_v1 }
 0x520   :  { %v2456_v5 = vpop.eup %2455  ;;  %1788 = vst.msk [vmem:[#allocation12 + $0x48] sm:$0xff] %vm136_vm0, %v2454_v53  ;;  %2465 = vrcp.f32 %v1746_v2 }
 0x521   :  { %1787 = vst.msk [vmem:[#allocation12 + $0x40] sm:$0xff] %vm136_vm0, %v2456_v5  ;;  %2467 = vrcp.f32 %v1745_v3 }
 0x523   :  { %v2458_v8 = vpop.eup %2457 }
 0x524   :  { %v2460_v9 = vpop.eup %2459  ;;  %1790 = vst.msk [vmem:[#allocation12 + $0x58] sm:$0xff] %vm136_vm0, %v2458_v8 }
 0x525   :  { %1789 = vst.msk [vmem:[#allocation12 + $0x50] sm:$0xff] %vm136_vm0, %v2460_v9 }
 0x526   :  { %v2462_v60 = vpop.eup %2461 }
 0x527   :  { %v2464_v10 = vpop.eup %2463  ;;  %1792 = vst.msk [vmem:[#allocation12 + $0x68] sm:$0xff] %vm136_vm0, %v2462_v60 }
 0x528   :  { %1791 = vst.msk [vmem:[#allocation12 + $0x60] sm:$0xff] %vm136_vm0, %v2464_v10 }
 0x52a   :  { %v2466_v12 = vpop.eup %2465 }
 0x52b   :  { %v2468_v13 = vpop.eup %2467  ;;  %1794 = vst.msk [vmem:[#allocation12 + $0x78] sm:$0xff] %vm136_vm0, %v2466_v12 }
 0x52c   :  { %1793 = vst.msk [vmem:[#allocation12 + $0x70] sm:$0xff] %vm136_vm0, %v2468_v13 }
 0x52d   :  { %2612 = shalt.err (!%p2609_p10)
}
 0x52e   :  { %s2613_s6 = scalar_lea.hbm %s3292_s12, 2048 }
 0x52f   :  { %p2614_p11 = scmp.ne.s32.totalorder %s3292_s12, %s2613_s6  ;;  %p2617_p12 = scmp.lt.u32.totalorder %s2613_s6, %s3292_s12 }
 0x531   :  { %p2619_p13 = pnand %p2617_p12, %p2614_p11 }
 0x533   :  { %2622 = shalt.err (!%p2619_p13)
}
 0x534   :  { %1816 = dma.vmem_to_hbm [thread:$0]  %s1811_s13, 2048, %s3292_s12, [#allocation5], %s2635_s20, %s2635_s20, %s2636_s21  }
 0x535   :  { %2629 = dma.done.wait [#allocation5], 2048  }
 0x536   :  { %2630 = vsyncadd [#allocation5], 4294965248 }
 0x537   :  { %2631 = dma.done.wait [#allocation14], 256  }
 0x538   :  { %2632 = vsyncadd [#allocation14], 4294967040 }
 0x539   :  { %1835 = vsyncpa [#allocation4], 1 }
 0x53a   :  { %1836 = vsyncpa [#allocation7], 1 }
 0x53b   :  { %1837 = vsyncpa [#allocation10], 1 }
 0x53c   :  { %1838 = vsyncpa [#allocation5], 1 }
 0x53d   :  { %1839 = vsyncpa [#allocation14], 1 }

</bundles_post_ra>
